<compile_context>
chip_gen: v5e
topology: v5e:2x2
jax: 0.10.0
libtpu: 0.0.40
codegen_flags: <defaults>
</compile_context>

<pallas_src>
import numpy as np
import jax
import jax.numpy as jnp
from jax.experimental import pallas as pl
from jax.experimental.pallas import tpu as pltpu


# ------------------------------------------------------------------ linear maps

def _adaptive_pool_matrix(out_size, in_size):
    # Exact PyTorch AdaptiveAvgPool window rule: [floor(i*n/o), ceil((i+1)*n/o))
    P = np.zeros((out_size, in_size), dtype=np.float32)
    for i in range(out_size):
        start = (i * in_size) // out_size
        end = -(-((i + 1) * in_size) // out_size)  # ceil
        P[i, start:end] = 1.0 / (end - start)
    return P


def _bilinear_matrix(out_size, in_size):
    # align_corners=True bilinear interpolation along one axis.
    U = np.zeros((out_size, in_size), dtype=np.float32)
    if in_size == 1:
        U[:, 0] = 1.0
        return U
    scale = (in_size - 1) / (out_size - 1)
    for i in range(out_size):
        src = i * scale
        lo = min(int(np.floor(src)), in_size - 1)
        hi = min(lo + 1, in_size - 1)
        frac = src - lo
        U[i, lo] += 1.0 - frac
        U[i, hi] += frac
    return U


def _round_bf16(a):
    # Round master weights to bf16-representable values (kernel and reference share them).
    return np.asarray(jnp.asarray(a, jnp.float32).astype(jnp.bfloat16).astype(jnp.float32))


# ------------------------------------------------------------------ fused kernel

def _psp_fused_kernel(x_ref, pall_ref, wcall_ref, sshift_ref, bmask_ref,
                      uall_ref, w3_ref, bshift_ref, o_ref, y_sc, cat_sc):
    # x_ref     (H, W, C)        bf16  full image (DMA'd once per image)
    # pall_ref  (SP, H*W)        bf16  stacked adaptive-pool matrices (SP = sum bin^2)
    # wcall_ref (C, S*O)         bf16  stacked 1x1-conv weights (BN scale folded)
    # sshift_ref(1, S*O)         f32   stacked stage BN shifts
    # bmask_ref (SP, S*O)        f32   block-diagonal stage mask
    # uall_ref  (H*W, SP)        bf16  stacked bilinear-upsample matrices
    # w3_ref    (3, Cc, 3*Opad)  bf16  bottleneck weights (BN folded), dy leading, dx in N
    # bshift_ref(1, Opad)        f32   bottleneck BN shift (O padded to Opad)
    # o_ref     (TH, W, Opad)    f32   output row strip
    # y_sc      (SP, S*O)        bf16  scratch: pooled-stage activations (per image)
    # cat_sc    (TH+2, W, Cc)    bf16  scratch: strip of concat features + 1-row halo
    s = pl.program_id(1)
    ns = pl.num_programs(1)
    H, W, C = x_ref.shape
    TH = o_ref.shape[0]
    Opad = o_ref.shape[2]
    SO = wcall_ref.shape[1]
    Cc = cat_sc.shape[2]
    THW = TH * W

    # ---- pyramid stages at pooled resolution: once per image (strip axis is sequential)
    @pl.when(s == 0)
    def _():
        x_flat = x_ref[...].reshape(H * W, C)
        pooled = jnp.dot(pall_ref[...], x_flat,
                         preferred_element_type=jnp.float32)              # (SP, C)
        y = jnp.dot(pooled.astype(jnp.bfloat16), wcall_ref[...],
                    preferred_element_type=jnp.float32)                   # (SP, S*O)
        y = jnp.maximum(y + sshift_ref[...], 0.0) * bmask_ref[...]        # conv+BN+ReLU (f32)
        y_sc[...] = y.astype(jnp.bfloat16)

    y_bf = y_sc[...]
    r0 = pl.multiple_of(s * TH, TH)

    # ---- build the (TH+2, W, Cc) strip of concat([x, upsampled stages]) + 1-row halo
    cat_sc[0:1, :, :] = jnp.zeros((1, W, Cc), jnp.bfloat16)               # top halo default
    cat_sc[TH + 1:TH + 2, :, :] = jnp.zeros((1, W, Cc), jnp.bfloat16)     # bottom halo default

    cat_sc[1:TH + 1, :, 0:C] = x_ref[pl.ds(r0, TH)]
    up_mid = jnp.dot(uall_ref[pl.ds(pl.multiple_of(r0 * W, THW), THW), :], y_bf,
                     preferred_element_type=jnp.float32)                  # (TH*W, S*O)
    cat_sc[1:TH + 1, :, C:Cc] = up_mid.astype(jnp.bfloat16).reshape(TH, W, SO)

    @pl.when(s > 0)
    def _():
        g = r0 - 1
        cat_sc[0:1, :, 0:C] = x_ref[pl.ds(g, 1)]
        uh = jnp.dot(uall_ref[pl.ds(pl.multiple_of(g * W, W), W), :], y_bf,
                     preferred_element_type=jnp.float32)
        cat_sc[0:1, :, C:Cc] = uh.astype(jnp.bfloat16).reshape(1, W, SO)

    @pl.when(s < ns - 1)
    def _():
        g = r0 + TH
        cat_sc[TH + 1:TH + 2, :, 0:C] = x_ref[pl.ds(g, 1)]
        uh = jnp.dot(uall_ref[pl.ds(pl.multiple_of(g * W, W), W), :], y_bf,
                     preferred_element_type=jnp.float32)
        cat_sc[TH + 1:TH + 2, :, C:Cc] = uh.astype(jnp.bfloat16).reshape(1, W, SO)

    # ---- 3x3 bottleneck conv (padding=1) on the strip:
    #      3 matmuls over dy with the 3 dx taps packed into the output (lane) dim;
    #      W-shifts applied to the f32 result.
    zc = jnp.zeros((TH, 1, Opad), jnp.float32)
    acc = None
    for dy in range(3):
        lhs = cat_sc[dy:dy + TH, :, :].reshape(THW, Cc)                   # bf16
        r = jnp.dot(lhs, w3_ref[dy], preferred_element_type=jnp.float32)  # (TH*W, 3*Opad)
        r = r.reshape(TH, W, 3 * Opad)
        left = jnp.concatenate([zc, r[:, :W - 1, 0:Opad]], axis=1)        # dx = 0
        center = r[:, :, Opad:2 * Opad]                                   # dx = 1
        right = jnp.concatenate([r[:, 1:, 2 * Opad:3 * Opad], zc], axis=1)  # dx = 2
        c = left + center + right
        acc = c if acc is None else acc + c                               # init from 1st tap

    # BN (scale folded into weights) + shift + ReLU.
    # TODO(synk): Dropout2d(0.1) is identity in eval mode; training-mode dropout not implemented.
    o_ref[...] = jnp.maximum(acc + bshift_ref[...], 0.0).astype(o_ref.dtype)


# ------------------------------------------------------------------ wrapper

def psp_module_forward(x_nchw, params):
    x = jnp.transpose(x_nchw, (0, 2, 3, 1)).astype(jnp.bfloat16)  # NCHW -> NHWC, bf16 storage
    N, H, W, C = x.shape
    SP, HW = params["p_all"].shape
    SO = params["wc_all"].shape[1]
    Opad = params["bshift"].shape[1]
    O = params["stages_ref"][0]["wc"].shape[1]
    Cc = C + SO

    TH = 8 if (H % 8 == 0 and H >= 8) else H       # row-strip height (production: TH*W ~ 256-512)
    NS = H // TH

    def nb(shape, dt):
        return int(np.prod(shape)) * jnp.dtype(dt).itemsize

    # VMEM budget derived from the actual blocks (weights single-buffered, x/out double).
    vmem_need = (2 * nb((H, W, C), jnp.bfloat16)
                 + nb((SP, HW), jnp.bfloat16) + nb((HW, SP), jnp.bfloat16)
                 + nb((C, SO), jnp.bfloat16) + nb((3, Cc, 3 * Opad), jnp.bfloat16)
                 + nb((SP, SO), jnp.float32) + nb((1, SO), jnp.float32) + nb((1, Opad), jnp.float32)
                 + 2 * nb((TH, W, Opad), jnp.float32)
                 + nb((SP, SO), jnp.bfloat16) + nb((TH + 2, W, Cc), jnp.bfloat16))
    vmem_limit = int(min(max(4 * vmem_need, 32 << 20), 48 << 20))

    flops = N * (2 * SP * HW * C + 2 * SP * C * SO + 2 * HW * SP * SO
                 + 2 * HW * Cc * 9 * Opad)
    bytes_accessed = (N * HW * C * 2
                      + (SP * HW + HW * SP + C * SO + 3 * Cc * 3 * Opad) * 2
                      + (SP * SO + SO + Opad) * 4
                      + N * HW * Opad * 4)

    const = dict(pipeline_mode=pl.Buffered(1))      # constant across the grid: single buffer

    out = pl.pallas_call(
        _psp_fused_kernel,
        out_shape=jax.ShapeDtypeStruct((N, H, W, Opad), jnp.float32),
        grid_spec=pltpu.PrefetchScalarGridSpec(
            num_scalar_prefetch=0,
            grid=(N, NS),
            in_specs=[
                pl.BlockSpec((None, H, W, C), lambda b, s: (b, 0, 0, 0)),
                pl.BlockSpec((SP, HW), lambda b, s: (0, 0), **const),
                pl.BlockSpec((C, SO), lambda b, s: (0, 0), **const),
                pl.BlockSpec((1, SO), lambda b, s: (0, 0), **const),
                pl.BlockSpec((SP, SO), lambda b, s: (0, 0), **const),
                pl.BlockSpec((HW, SP), lambda b, s: (0, 0), **const),
                pl.BlockSpec((3, Cc, 3 * Opad), lambda b, s: (0, 0, 0), **const),
                pl.BlockSpec((1, Opad), lambda b, s: (0, 0), **const),
            ],
            out_specs=pl.BlockSpec((None, TH, W, Opad), lambda b, s: (b, s, 0, 0)),
            scratch_shapes=[
                pltpu.VMEM((SP, SO), jnp.bfloat16),        # pooled-stage activations
                pltpu.VMEM((TH + 2, W, Cc), jnp.bfloat16),  # concat strip + halo
            ],
        ),
        compiler_params=pltpu.CompilerParams(
            # batch is megacore-parallel; the strip axis must stay sequential because the
            # pooled-stage scratch is computed once per image at s == 0 and reused.
            dimension_semantics=("parallel", "arbitrary"),
            vmem_limit_bytes=vmem_limit,
        ),
        cost_estimate=pl.CostEstimate(flops=int(flops), transcendentals=0,
                                      bytes_accessed=int(bytes_accessed)),
    )(x, params["p_all"], params["wc_all"], params["sshift"], params["bmask"],
      params["u_all"], params["w3"], params["bshift"])

    out = out[..., :O]                              # drop lane padding
    return jnp.transpose(out, (0, 3, 1, 2))         # NHWC -> NCHW


# ------------------------------------------------------------------ params

def _folded_bn(keys, O, eps=1e-5):
    kg, kb, km, kv = keys
    gamma = jax.random.uniform(kg, (O,), jnp.float32, 0.5, 1.5)
    beta = jax.random.normal(kb, (O,), jnp.float32) * 0.1
    mean = jax.random.normal(km, (O,), jnp.float32) * 0.1
    var = jax.random.uniform(kv, (O,), jnp.float32, 0.5, 1.5)
    scale = gamma / jnp.sqrt(var + eps)
    shift = beta - mean * scale
    return np.asarray(scale), np.asarray(shift)


def init_psp_params(key, in_channels, pool_sizes, H, W):
    S = len(pool_sizes)
    O = in_channels // S
    SO = S * O
    O_pad = ((O + 127) // 128) * 128
    C = in_channels
    Cc = C + SO
    keys = jax.random.split(key, S + 1)

    offsets = np.cumsum([0] + [ps * ps for ps in pool_sizes])
    SP = int(offsets[-1])

    p_rows, u_cols, wc_cols, shift_cols, stages_ref = [], [], [], [], []
    bmask = np.zeros((SP, SO), np.float32)
    for s, (ps, k) in enumerate(zip(pool_sizes, keys[:-1])):
        ks = jax.random.split(k, 5)
        wc = _round_bf16(np.asarray(jax.random.normal(ks[0], (C, O), jnp.float32)) * 0.1)
        scale, shift = _folded_bn(ks[1:5], O)
        ph, pw = _adaptive_pool_matrix(ps, H), _adaptive_pool_matrix(ps, W)
        uh, uw = _bilinear_matrix(H, ps), _bilinear_matrix(W, ps)
        pool2d = _round_bf16(np.kron(ph, pw))               # (ps*ps, H*W)
        up2d = _round_bf16(np.kron(uh, uw))                  # (H*W, ps*ps)
        p_rows.append(pool2d)
        u_cols.append(up2d)
        wc_cols.append(wc * scale[None, :])                  # BN scale folded into conv
        shift_cols.append(shift)
        bmask[offsets[s]:offsets[s + 1], s * O:(s + 1) * O] = 1.0
        stages_ref.append(dict(pw=jnp.asarray(pool2d), up=jnp.asarray(up2d),
                               wc=jnp.asarray(wc), scale=jnp.asarray(scale),
                               shift=jnp.asarray(shift)))

    kb = jax.random.split(keys[-1], 5)
    w3 = _round_bf16(np.asarray(jax.random.normal(kb[0], (3, 3, Cc, O), jnp.float32)) * 0.05)
    bscale, bshift = _folded_bn(kb[1:5], O)
    w3_folded = w3 * bscale[None, None, None, :]
    # pad O -> O_pad (lane-dense stores, MXU-friendly N) and pack dx into the output dim
    w3_p = np.zeros((3, 3, Cc, O_pad), np.float32)
    w3_p[..., :O] = w3_folded
    w3_packed = np.transpose(w3_p, (0, 2, 1, 3)).reshape(3, Cc, 3 * O_pad)
    bshift_p = np.zeros((O_pad,), np.float32)
    bshift_p[:O] = bshift

    return dict(
        # fused-kernel operands (bf16 storage for matmul operands, f32 for epilogue terms)
        p_all=jnp.asarray(np.concatenate(p_rows, axis=0), jnp.bfloat16),   # (SP, H*W)
        u_all=jnp.asarray(np.concatenate(u_cols, axis=1), jnp.bfloat16),   # (H*W, SP)
        wc_all=jnp.asarray(np.concatenate(wc_cols, axis=1), jnp.bfloat16),  # (C, S*O)
        sshift=jnp.asarray(np.concatenate(shift_cols)[None, :], jnp.float32),  # (1, S*O)
        bmask=jnp.asarray(bmask),                                          # (SP, S*O)
        w3=jnp.asarray(w3_packed, jnp.bfloat16),                           # (3, Cc, 3*Opad)
        bshift=jnp.asarray(bshift_p[None, :], jnp.float32),                # (1, Opad)
        # reference-path (unfolded) params
        stages_ref=stages_ref,
        bottleneck_ref=dict(w=jnp.asarray(w3), scale=jnp.asarray(bscale),
                            shift=jnp.asarray(bshift)),
    )


# ------------------------------------------------------------------ reference

def psp_reference(x_nchw, params):
    # Plain-JAX f32 reference (mirrors the kernel's bf16 input storage at the boundary).
    x = jnp.transpose(x_nchw, (0, 2, 3, 1))
    x = x.astype(jnp.bfloat16).astype(jnp.float32)
    N, H, W, C = x.shape
    xf = x.reshape(N, H * W, C)
    pyramids = [x]
    for sp in params["stages_ref"]:
        pooled = jnp.einsum('pk,nkc->npc', sp["pw"], xf)
        y = jnp.einsum('npc,co->npo', pooled, sp["wc"])
        y = jnp.maximum(y * sp["scale"] + sp["shift"], 0.0)
        up = jnp.einsum('kp,npo->nko', sp["up"], y)
        pyramids.append(up.reshape(N, H, W, -1))
    cat = jnp.concatenate(pyramids, axis=-1)
    bp = params["bottleneck_ref"]
    out = jax.lax.conv_general_dilated(
        cat, bp["w"], window_strides=(1, 1), padding=((1, 1), (1, 1)),
        dimension_numbers=('NHWC', 'HWIO', 'NHWC'))
    out = jnp.maximum(out * bp["scale"] + bp["shift"], 0.0)
    return jnp.transpose(out, (0, 3, 1, 2))


# ------------------------------------------------------------------ main

if __name__ == "__main__":
    N, C, H, W = 2, 16, 16, 16
    pool_sizes = (1, 2, 3, 6)            # out_channels = 16 // 4 = 4
    key = jax.random.PRNGKey(0)
    kx, kp = jax.random.split(key)
    x = jax.random.normal(kx, (N, C, H, W), jnp.float32)   # NCHW, like PyTorch
    params = init_psp_params(kp, C, pool_sizes, H, W)

    out = jax.block_until_ready(jax.jit(psp_module_forward)(x, params))
    ref = jax.block_until_ready(psp_reference(x, params))

    assert out.shape == (N, C // len(pool_sizes), H, W), out.shape
    err = float(np.max(np.abs(np.asarray(out) - np.asarray(ref))))
    assert np.allclose(np.asarray(out), np.asarray(ref), atol=3e-2, rtol=3e-2), err
    print("KERNEL_OK")
</pallas_src>

<mosaic_0001>
module attributes {stable_mosaic.version = 11 : i64} {
  func.func @_psp_fused_kernel(%arg0: i32, %arg1: i32, %arg2: memref<1x16x16x16xbf16, #tpu.memory_space<vmem>>, %arg3: memref<50x256xbf16, #tpu.memory_space<vmem>>, %arg4: memref<16x16xbf16, #tpu.memory_space<vmem>>, %arg5: memref<1x16xf32, #tpu.memory_space<vmem>>, %arg6: memref<50x16xf32, #tpu.memory_space<vmem>>, %arg7: memref<256x50xbf16, #tpu.memory_space<vmem>>, %arg8: memref<3x32x384xbf16, #tpu.memory_space<vmem>>, %arg9: memref<1x128xf32, #tpu.memory_space<vmem>>, %arg10: memref<1x8x16x128xf32, #tpu.memory_space<vmem>>, %arg11: memref<50x16xbf16, #tpu.memory_space<vmem>>, %arg12: memref<10x16x32xbf16, #tpu.memory_space<vmem>>) attributes {dimension_semantics = [#tpu.dimension_semantics<parallel>, #tpu.dimension_semantics<arbitrary>], iteration_bounds = array<i64: 2, 2>, scalar_prefetch = 0 : i64, scratch_operands = 2 : i64, tpu.core_type = #tpu.core_type<tc>, window_params = [{transform_indices = @transform_0, window_bounds = array<i64: 1, 16, 16, 16>}, {pipeline_mode = #tpu.pipeline_mode<synchronous>, transform_indices = @transform_1, window_bounds = array<i64: 50, 256>}, {pipeline_mode = #tpu.pipeline_mode<synchronous>, transform_indices = @transform_2, window_bounds = array<i64: 16, 16>}, {pipeline_mode = #tpu.pipeline_mode<synchronous>, transform_indices = @transform_3, window_bounds = array<i64: 1, 16>}, {pipeline_mode = #tpu.pipeline_mode<synchronous>, transform_indices = @transform_4, window_bounds = array<i64: 50, 16>}, {pipeline_mode = #tpu.pipeline_mode<synchronous>, transform_indices = @transform_5, window_bounds = array<i64: 256, 50>}, {pipeline_mode = #tpu.pipeline_mode<synchronous>, transform_indices = @transform_6, window_bounds = array<i64: 3, 32, 384>}, {pipeline_mode = #tpu.pipeline_mode<synchronous>, transform_indices = @transform_7, window_bounds = array<i64: 1, 128>}, {transform_indices = @transform_8, window_bounds = array<i64: 1, 8, 16, 128>}]} {
    %c0_i32 = arith.constant 0 : i32
    %0 = arith.cmpi eq, %arg1, %c0_i32 : i32
    %1 = arith.extui %0 : i1 to i32
    %c0_i32_0 = arith.constant 0 : i32
    %2 = arith.cmpi ne, %1, %c0_i32_0 : i32
    scf.if %2 {
      %c0_48 = arith.constant 0 : index
      %c0_49 = arith.constant 0 : index
      %c0_50 = arith.constant 0 : index
      %c0_51 = arith.constant 0 : index
      %79 = vector.load %arg2[%c0_48, %c0_49, %c0_50, %c0_51] : memref<1x16x16x16xbf16, #tpu.memory_space<vmem>>, vector<1x16x16x16xbf16>
      %80 = vector.shape_cast %79 : vector<1x16x16x16xbf16> to vector<16x16x16xbf16>
      %81 = vector.shape_cast %80 : vector<16x16x16xbf16> to vector<256x16xbf16>
      %c0_52 = arith.constant 0 : index
      %c0_53 = arith.constant 0 : index
      %82 = vector.load %arg3[%c0_52, %c0_53] : memref<50x256xbf16, #tpu.memory_space<vmem>>, vector<50x256xbf16>
      %cst_54 = arith.constant dense<0.000000e+00> : vector<50x16xf32>
      %83 = tpu.matmul %82, %81, %cst_54 {dimension_numbers = #tpu.dot_dimension_numbers<[1], [0], [0], [1], [0, 0, 1, 1], [], []>} : vector<50x256xbf16>, vector<256x16xbf16>, vector<50x16xf32> -> vector<50x16xf32>
      %84 = arith.truncf %83 : vector<50x16xf32> to vector<50x16xbf16>
      %c0_55 = arith.constant 0 : index
      %c0_56 = arith.constant 0 : index
      %85 = vector.load %arg4[%c0_55, %c0_56] : memref<16x16xbf16, #tpu.memory_space<vmem>>, vector<16x16xbf16>
      %cst_57 = arith.constant dense<0.000000e+00> : vector<50x16xf32>
      %86 = tpu.matmul %84, %85, %cst_57 {dimension_numbers = #tpu.dot_dimension_numbers<[1], [0], [0], [1], [0, 0, 1, 1], [], []>} : vector<50x16xbf16>, vector<16x16xbf16>, vector<50x16xf32> -> vector<50x16xf32>
      %c0_58 = arith.constant 0 : index
      %c0_59 = arith.constant 0 : index
      %87 = vector.load %arg5[%c0_58, %c0_59] : memref<1x16xf32, #tpu.memory_space<vmem>>, vector<1x16xf32>
      %88 = vector.broadcast %87 : vector<1x16xf32> to vector<50x16xf32>
      %89 = arith.addf %86, %88 : vector<50x16xf32>
      %cst_60 = arith.constant 0.000000e+00 : f32
      %90 = vector.broadcast %cst_60 : f32 to vector<50x16xf32>
      %91 = arith.maximumf %89, %90 : vector<50x16xf32>
      %c0_61 = arith.constant 0 : index
      %c0_62 = arith.constant 0 : index
      %92 = vector.load %arg6[%c0_61, %c0_62] : memref<50x16xf32, #tpu.memory_space<vmem>>, vector<50x16xf32>
      %93 = arith.mulf %91, %92 : vector<50x16xf32>
      %94 = arith.truncf %93 : vector<50x16xf32> to vector<50x16xbf16>
      %c0_63 = arith.constant 0 : index
      %c0_64 = arith.constant 0 : index
      %95 = vector.load %arg11[%c0_63, %c0_64] : memref<50x16xbf16, #tpu.memory_space<vmem>>, vector<50x16xbf16>
      tpu.vector_store %arg11[%c0_63, %c0_64], %94 {strides = array<i32>} : memref<50x16xbf16, #tpu.memory_space<vmem>>, vector<50x16xbf16>,
    } else {
    }
    %c0 = arith.constant 0 : index
    %c0_1 = arith.constant 0 : index
    %3 = vector.load %arg11[%c0, %c0_1] : memref<50x16xbf16, #tpu.memory_space<vmem>>, vector<50x16xbf16>
    %c8_i32 = arith.constant 8 : i32
    %4 = arith.muli %arg1, %c8_i32 : i32
    %5 = tpu.assume_multiple %4, 8 : i32
    %cst = arith.constant 0.000000e+00 : bf16
    %6 = vector.broadcast %cst : bf16 to vector<1x16x32xbf16>
    %c0_2 = arith.constant 0 : index
    %c0_3 = arith.constant 0 : index
    %c0_4 = arith.constant 0 : index
    %7 = vector.load %arg12[%c0_2, %c0_3, %c0_4] : memref<10x16x32xbf16, #tpu.memory_space<vmem>>, vector<1x16x32xbf16>
    tpu.vector_store %arg12[%c0_2, %c0_3, %c0_4], %6 {strides = array<i32>} : memref<10x16x32xbf16, #tpu.memory_space<vmem>>, vector<1x16x32xbf16>,
    %cst_5 = arith.constant 0.000000e+00 : bf16
    %8 = vector.broadcast %cst_5 : bf16 to vector<1x16x32xbf16>
    %c9 = arith.constant 9 : index
    %c0_6 = arith.constant 0 : index
    %c0_7 = arith.constant 0 : index
    %9 = vector.load %arg12[%c9, %c0_6, %c0_7] : memref<10x16x32xbf16, #tpu.memory_space<vmem>>, vector<1x16x32xbf16>
    tpu.vector_store %arg12[%c9, %c0_6, %c0_7], %8 {strides = array<i32>} : memref<10x16x32xbf16, #tpu.memory_space<vmem>>, vector<1x16x32xbf16>,
    %c0_8 = arith.constant 0 : index
    %10 = arith.index_cast %5 : i32 to index
    %c0_9 = arith.constant 0 : index
    %c0_10 = arith.constant 0 : index
    %11 = vector.load %arg2[%c0_8, %10, %c0_9, %c0_10] : memref<1x16x16x16xbf16, #tpu.memory_space<vmem>>, vector<1x8x16x16xbf16>
    %12 = vector.shape_cast %11 : vector<1x8x16x16xbf16> to vector<8x16x16xbf16>
    %c1 = arith.constant 1 : index
    %c0_11 = arith.constant 0 : index
    %c0_12 = arith.constant 0 : index
    %13 = vector.load %arg12[%c1, %c0_11, %c0_12] : memref<10x16x32xbf16, #tpu.memory_space<vmem>>, vector<8x16x16xbf16>
    tpu.vector_store %arg12[%c1, %c0_11, %c0_12], %12 {strides = array<i32>} : memref<10x16x32xbf16, #tpu.memory_space<vmem>>, vector<8x16x16xbf16>,
    %c16_i32 = arith.constant 16 : i32
    %14 = arith.muli %5, %c16_i32 : i32
    %15 = tpu.assume_multiple %14, 128 : i32
    %16 = arith.index_cast %15 : i32 to index
    %c0_13 = arith.constant 0 : index
    %17 = vector.load %arg7[%16, %c0_13] : memref<256x50xbf16, #tpu.memory_space<vmem>>, vector<128x50xbf16>
    %cst_14 = arith.constant dense<0.000000e+00> : vector<128x16xf32>
    %18 = tpu.matmul %17, %3, %cst_14 {dimension_numbers = #tpu.dot_dimension_numbers<[1], [0], [0], [1], [0, 0, 1, 1], [], []>} : vector<128x50xbf16>, vector<50x16xbf16>, vector<128x16xf32> -> vector<128x16xf32>
    %19 = arith.truncf %18 : vector<128x16xf32> to vector<128x16xbf16>
    %20 = vector.shape_cast %19 : vector<128x16xbf16> to vector<8x16x16xbf16>
    %c1_15 = arith.constant 1 : index
    %c0_16 = arith.constant 0 : index
    %c16 = arith.constant 16 : index
    %21 = vector.load %arg12[%c1_15, %c0_16, %c16] : memref<10x16x32xbf16, #tpu.memory_space<vmem>>, vector<8x16x16xbf16>
    tpu.vector_store %arg12[%c1_15, %c0_16, %c16], %20 {strides = array<i32>} : memref<10x16x32xbf16, #tpu.memory_space<vmem>>, vector<8x16x16xbf16>,
    %c0_i32_17 = arith.constant 0 : i32
    %22 = arith.cmpi sgt, %arg1, %c0_i32_17 : i32
    %23 = arith.extui %22 : i1 to i32
    %c0_i32_18 = arith.constant 0 : i32
    %24 = arith.cmpi ne, %23, %c0_i32_18 : i32
    scf.if %24 {
      %c1_i32_48 = arith.constant 1 : i32
      %79 = arith.subi %5, %c1_i32_48 : i32
      %c0_49 = arith.constant 0 : index
      %80 = arith.index_cast %79 : i32 to index
      %c0_50 = arith.constant 0 : index
      %c0_51 = arith.constant 0 : index
      %81 = vector.load %arg2[%c0_49, %80, %c0_50, %c0_51] : memref<1x16x16x16xbf16, #tpu.memory_space<vmem>>, vector<1x1x16x16xbf16>
      %82 = vector.shape_cast %81 : vector<1x1x16x16xbf16> to vector<1x16x16xbf16>
      %c0_52 = arith.constant 0 : index
      %c0_53 = arith.constant 0 : index
      %c0_54 = arith.constant 0 : index
      %83 = vector.load %arg12[%c0_52, %c0_53, %c0_54] : memref<10x16x32xbf16, #tpu.memory_space<vmem>>, vector<1x16x16xbf16>
      tpu.vector_store %arg12[%c0_52, %c0_53, %c0_54], %82 {strides = array<i32>} : memref<10x16x32xbf16, #tpu.memory_space<vmem>>, vector<1x16x16xbf16>,
      %c16_i32_55 = arith.constant 16 : i32
      %84 = arith.muli %79, %c16_i32_55 : i32
      %85 = tpu.assume_multiple %84, 16 : i32
      %86 = arith.index_cast %85 : i32 to index
      %c0_56 = arith.constant 0 : index
      %87 = vector.load %arg7[%86, %c0_56] : memref<256x50xbf16, #tpu.memory_space<vmem>>, vector<16x50xbf16>
      %cst_57 = arith.constant dense<0.000000e+00> : vector<16x16xf32>
      %88 = tpu.matmul %87, %3, %cst_57 {dimension_numbers = #tpu.dot_dimension_numbers<[1], [0], [0], [1], [0, 0, 1, 1], [], []>} : vector<16x50xbf16>, vector<50x16xbf16>, vector<16x16xf32> -> vector<16x16xf32>
      %89 = arith.truncf %88 : vector<16x16xf32> to vector<16x16xbf16>
      %90 = vector.shape_cast %89 : vector<16x16xbf16> to vector<1x16x16xbf16>
      %c0_58 = arith.constant 0 : index
      %c0_59 = arith.constant 0 : index
      %c16_60 = arith.constant 16 : index
      %91 = vector.load %arg12[%c0_58, %c0_59, %c16_60] : memref<10x16x32xbf16, #tpu.memory_space<vmem>>, vector<1x16x16xbf16>
      tpu.vector_store %arg12[%c0_58, %c0_59, %c16_60], %90 {strides = array<i32>} : memref<10x16x32xbf16, #tpu.memory_space<vmem>>, vector<1x16x16xbf16>,
    } else {
    }
    %c1_i32 = arith.constant 1 : i32
    %25 = arith.cmpi slt, %arg1, %c1_i32 : i32
    %26 = arith.extui %25 : i1 to i32
    %c0_i32_19 = arith.constant 0 : i32
    %27 = arith.cmpi ne, %26, %c0_i32_19 : i32
    scf.if %27 {
      %c8_i32_48 = arith.constant 8 : i32
      %79 = arith.addi %5, %c8_i32_48 : i32
      %c0_49 = arith.constant 0 : index
      %80 = arith.index_cast %79 : i32 to index
      %c0_50 = arith.constant 0 : index
      %c0_51 = arith.constant 0 : index
      %81 = vector.load %arg2[%c0_49, %80, %c0_50, %c0_51] : memref<1x16x16x16xbf16, #tpu.memory_space<vmem>>, vector<1x1x16x16xbf16>
      %82 = vector.shape_cast %81 : vector<1x1x16x16xbf16> to vector<1x16x16xbf16>
      %c9_52 = arith.constant 9 : index
      %c0_53 = arith.constant 0 : index
      %c0_54 = arith.constant 0 : index
      %83 = vector.load %arg12[%c9_52, %c0_53, %c0_54] : memref<10x16x32xbf16, #tpu.memory_space<vmem>>, vector<1x16x16xbf16>
      tpu.vector_store %arg12[%c9_52, %c0_53, %c0_54], %82 {strides = array<i32>} : memref<10x16x32xbf16, #tpu.memory_space<vmem>>, vector<1x16x16xbf16>,
      %c16_i32_55 = arith.constant 16 : i32
      %84 = arith.muli %79, %c16_i32_55 : i32
      %85 = tpu.assume_multiple %84, 16 : i32
      %86 = arith.index_cast %85 : i32 to index
      %c0_56 = arith.constant 0 : index
      %87 = vector.load %arg7[%86, %c0_56] : memref<256x50xbf16, #tpu.memory_space<vmem>>, vector<16x50xbf16>
      %cst_57 = arith.constant dense<0.000000e+00> : vector<16x16xf32>
      %88 = tpu.matmul %87, %3, %cst_57 {dimension_numbers = #tpu.dot_dimension_numbers<[1], [0], [0], [1], [0, 0, 1, 1], [], []>} : vector<16x50xbf16>, vector<50x16xbf16>, vector<16x16xf32> -> vector<16x16xf32>
      %89 = arith.truncf %88 : vector<16x16xf32> to vector<16x16xbf16>
      %90 = vector.shape_cast %89 : vector<16x16xbf16> to vector<1x16x16xbf16>
      %c9_58 = arith.constant 9 : index
      %c0_59 = arith.constant 0 : index
      %c16_60 = arith.constant 16 : index
      %91 = vector.load %arg12[%c9_58, %c0_59, %c16_60] : memref<10x16x32xbf16, #tpu.memory_space<vmem>>, vector<1x16x16xbf16>
      tpu.vector_store %arg12[%c9_58, %c0_59, %c16_60], %90 {strides = array<i32>} : memref<10x16x32xbf16, #tpu.memory_space<vmem>>, vector<1x16x16xbf16>,
    } else {
    }
    %cst_20 = arith.constant 0.000000e+00 : f32
    %28 = vector.broadcast %cst_20 : f32 to vector<8x1x128xf32>
    %c0_21 = arith.constant 0 : index
    %c0_22 = arith.constant 0 : index
    %c0_23 = arith.constant 0 : index
    %29 = vector.load %arg12[%c0_21, %c0_22, %c0_23] : memref<10x16x32xbf16, #tpu.memory_space<vmem>>, vector<8x16x32xbf16>
    %30 = vector.shape_cast %29 : vector<8x16x32xbf16> to vector<128x32xbf16>
    %c0_24 = arith.constant 0 : index
    %c0_25 = arith.constant 0 : index
    %c0_26 = arith.constant 0 : index
    %31 = vector.load %arg8[%c0_24, %c0_25, %c0_26] : memref<3x32x384xbf16, #tpu.memory_space<vmem>>, vector<1x32x384xbf16>
    %32 = vector.shape_cast %31 : vector<1x32x384xbf16> to vector<32x384xbf16>
    %cst_27 = arith.constant dense<0.000000e+00> : vector<128x384xf32>
    %33 = tpu.matmul %30, %32, %cst_27 {dimension_numbers = #tpu.dot_dimension_numbers<[1], [0], [0], [1], [0, 0, 1, 1], [], []>} : vector<128x32xbf16>, vector<32x384xbf16>, vector<128x384xf32> -> vector<128x384xf32>
    %34 = vector.shape_cast %33 : vector<128x384xf32> to vector<8x16x384xf32>
    %35 = vector.extract_strided_slice %34 {offsets = [0, 0, 0], sizes = [8, 15, 128], strides = [1, 1, 1]} : vector<8x16x384xf32> to vector<8x15x128xf32>
    %36 = tpu.concatenate %28, %35 in 1 : vector<8x1x128xf32>, vector<8x15x128xf32> -> vector<8x16x128xf32>
    %37 = vector.extract_strided_slice %34 {offsets = [0, 0, 128], sizes = [8, 16, 128], strides = [1, 1, 1]} : vector<8x16x384xf32> to vector<8x16x128xf32>
    %38 = vector.extract_strided_slice %34 {offsets = [0, 1, 256], sizes = [8, 15, 128], strides = [1, 1, 1]} : vector<8x16x384xf32> to vector<8x15x128xf32>
    %39 = tpu.concatenate %38, %28 in 1 : vector<8x15x128xf32>, vector<8x1x128xf32> -> vector<8x16x128xf32>
    %40 = arith.addf %36, %37 : vector<8x16x128xf32>
    %41 = arith.addf %40, %39 : vector<8x16x128xf32>
    %c1_28 = arith.constant 1 : index
    %c0_29 = arith.constant 0 : index
    %c0_30 = arith.constant 0 : index
    %42 = vector.load %arg12[%c1_28, %c0_29, %c0_30] : memref<10x16x32xbf16, #tpu.memory_space<vmem>>, vector<8x16x32xbf16>
    %43 = vector.shape_cast %42 : vector<8x16x32xbf16> to vector<128x32xbf16>
    %c1_31 = arith.constant 1 : index
    %c0_32 = arith.constant 0 : index
    %c0_33 = arith.constant 0 : index
    %44 = vector.load %arg8[%c1_31, %c0_32, %c0_33] : memref<3x32x384xbf16, #tpu.memory_space<vmem>>, vector<1x32x384xbf16>
    %45 = vector.shape_cast %44 : vector<1x32x384xbf16> to vector<32x384xbf16>
    %cst_34 = arith.constant dense<0.000000e+00> : vector<128x384xf32>
    %46 = tpu.matmul %43, %45, %cst_34 {dimension_numbers = #tpu.dot_dimension_numbers<[1], [0], [0], [1], [0, 0, 1, 1], [], []>} : vector<128x32xbf16>, vector<32x384xbf16>, vector<128x384xf32> -> vector<128x384xf32>
    %47 = vector.shape_cast %46 : vector<128x384xf32> to vector<8x16x384xf32>
    %48 = vector.extract_strided_slice %47 {offsets = [0, 0, 0], sizes = [8, 15, 128], strides = [1, 1, 1]} : vector<8x16x384xf32> to vector<8x15x128xf32>
    %49 = tpu.concatenate %28, %48 in 1 : vector<8x1x128xf32>, vector<8x15x128xf32> -> vector<8x16x128xf32>
    %50 = vector.extract_strided_slice %47 {offsets = [0, 0, 128], sizes = [8, 16, 128], strides = [1, 1, 1]} : vector<8x16x384xf32> to vector<8x16x128xf32>
    %51 = vector.extract_strided_slice %47 {offsets = [0, 1, 256], sizes = [8, 15, 128], strides = [1, 1, 1]} : vector<8x16x384xf32> to vector<8x15x128xf32>
    %52 = tpu.concatenate %51, %28 in 1 : vector<8x15x128xf32>, vector<8x1x128xf32> -> vector<8x16x128xf32>
    %53 = arith.addf %49, %50 : vector<8x16x128xf32>
    %54 = arith.addf %53, %52 : vector<8x16x128xf32>
    %55 = arith.addf %41, %54 : vector<8x16x128xf32>
    %c2 = arith.constant 2 : index
    %c0_35 = arith.constant 0 : index
    %c0_36 = arith.constant 0 : index
    %56 = vector.load %arg12[%c2, %c0_35, %c0_36] : memref<10x16x32xbf16, #tpu.memory_space<vmem>>, vector<8x16x32xbf16>
    %57 = vector.shape_cast %56 : vector<8x16x32xbf16> to vector<128x32xbf16>
    %c2_37 = arith.constant 2 : index
    %c0_38 = arith.constant 0 : index
    %c0_39 = arith.constant 0 : index
    %58 = vector.load %arg8[%c2_37, %c0_38, %c0_39] : memref<3x32x384xbf16, #tpu.memory_space<vmem>>, vector<1x32x384xbf16>
    %59 = vector.shape_cast %58 : vector<1x32x384xbf16> to vector<32x384xbf16>
    %cst_40 = arith.constant dense<0.000000e+00> : vector<128x384xf32>
    %60 = tpu.matmul %57, %59, %cst_40 {dimension_numbers = #tpu.dot_dimension_numbers<[1], [0], [0], [1], [0, 0, 1, 1], [], []>} : vector<128x32xbf16>, vector<32x384xbf16>, vector<128x384xf32> -> vector<128x384xf32>
    %61 = vector.shape_cast %60 : vector<128x384xf32> to vector<8x16x384xf32>
    %62 = vector.extract_strided_slice %61 {offsets = [0, 0, 0], sizes = [8, 15, 128], strides = [1, 1, 1]} : vector<8x16x384xf32> to vector<8x15x128xf32>
    %63 = tpu.concatenate %28, %62 in 1 : vector<8x1x128xf32>, vector<8x15x128xf32> -> vector<8x16x128xf32>
    %64 = vector.extract_strided_slice %61 {offsets = [0, 0, 128], sizes = [8, 16, 128], strides = [1, 1, 1]} : vector<8x16x384xf32> to vector<8x16x128xf32>
    %65 = vector.extract_strided_slice %61 {offsets = [0, 1, 256], sizes = [8, 15, 128], strides = [1, 1, 1]} : vector<8x16x384xf32> to vector<8x15x128xf32>
    %66 = tpu.concatenate %65, %28 in 1 : vector<8x15x128xf32>, vector<8x1x128xf32> -> vector<8x16x128xf32>
    %67 = arith.addf %63, %64 : vector<8x16x128xf32>
    %68 = arith.addf %67, %66 : vector<8x16x128xf32>
    %69 = arith.addf %55, %68 : vector<8x16x128xf32>
    %c0_41 = arith.constant 0 : index
    %c0_42 = arith.constant 0 : index
    %70 = vector.load %arg9[%c0_41, %c0_42] : memref<1x128xf32, #tpu.memory_space<vmem>>, vector<1x128xf32>
    %71 = vector.shape_cast %70 : vector<1x128xf32> to vector<1x1x128xf32>
    %72 = vector.broadcast %71 : vector<1x1x128xf32> to vector<8x16x128xf32>
    %73 = arith.addf %69, %72 : vector<8x16x128xf32>
    %cst_43 = arith.constant 0.000000e+00 : f32
    %74 = vector.broadcast %cst_43 : f32 to vector<8x16x128xf32>
    %75 = arith.maximumf %73, %74 : vector<8x16x128xf32>
    %c0_44 = arith.constant 0 : index
    %c0_45 = arith.constant 0 : index
    %c0_46 = arith.constant 0 : index
    %c0_47 = arith.constant 0 : index
    %76 = vector.load %arg10[%c0_44, %c0_45, %c0_46, %c0_47] : memref<1x8x16x128xf32, #tpu.memory_space<vmem>>, vector<1x8x16x128xf32>
    %77 = vector.shape_cast %76 : vector<1x8x16x128xf32> to vector<8x16x128xf32>
    %78 = vector.shape_cast %75 : vector<8x16x128xf32> to vector<1x8x16x128xf32>
    tpu.vector_store %arg10[%c0_44, %c0_45, %c0_46, %c0_47], %78 {strides = array<i32>} : memref<1x8x16x128xf32, #tpu.memory_space<vmem>>, vector<1x8x16x128xf32>,
    return
  }
  func.func @transform_0(%arg0: i32, %arg1: i32) -> (i32, i32, i32, i32) {
    %c0_i32 = arith.constant 0 : i32
    %c0_i32_0 = arith.constant 0 : i32
    %c0_i32_1 = arith.constant 0 : i32
    %c0_i32_2 = arith.constant 0 : i32
    return %arg0, %c0_i32, %c0_i32_0, %c0_i32_1 : i32, i32, i32, i32
  }
  func.func @transform_1(%arg0: i32, %arg1: i32) -> (i32, i32) {
    %c0_i32 = arith.constant 0 : i32
    %c0_i32_0 = arith.constant 0 : i32
    %c0_i32_1 = arith.constant 0 : i32
    return %c0_i32, %c0_i32_0 : i32, i32
  }
  func.func @transform_2(%arg0: i32, %arg1: i32) -> (i32, i32) {
    %c0_i32 = arith.constant 0 : i32
    %c0_i32_0 = arith.constant 0 : i32
    %c0_i32_1 = arith.constant 0 : i32
    return %c0_i32, %c0_i32_0 : i32, i32
  }
  func.func @transform_3(%arg0: i32, %arg1: i32) -> (i32, i32) {
    %c0_i32 = arith.constant 0 : i32
    %c0_i32_0 = arith.constant 0 : i32
    %c0_i32_1 = arith.constant 0 : i32
    return %c0_i32, %c0_i32_0 : i32, i32
  }
  func.func @transform_4(%arg0: i32, %arg1: i32) -> (i32, i32) {
    %c0_i32 = arith.constant 0 : i32
    %c0_i32_0 = arith.constant 0 : i32
    %c0_i32_1 = arith.constant 0 : i32
    return %c0_i32, %c0_i32_0 : i32, i32
  }
  func.func @transform_5(%arg0: i32, %arg1: i32) -> (i32, i32) {
    %c0_i32 = arith.constant 0 : i32
    %c0_i32_0 = arith.constant 0 : i32
    %c0_i32_1 = arith.constant 0 : i32
    return %c0_i32, %c0_i32_0 : i32, i32
  }
  func.func @transform_6(%arg0: i32, %arg1: i32) -> (i32, i32, i32) {
    %c0_i32 = arith.constant 0 : i32
    %c0_i32_0 = arith.constant 0 : i32
    %c0_i32_1 = arith.constant 0 : i32
    %c0_i32_2 = arith.constant 0 : i32
    return %c0_i32, %c0_i32_0, %c0_i32_1 : i32, i32, i32
  }
  func.func @transform_7(%arg0: i32, %arg1: i32) -> (i32, i32) {
    %c0_i32 = arith.constant 0 : i32
    %c0_i32_0 = arith.constant 0 : i32
    %c0_i32_1 = arith.constant 0 : i32
    return %c0_i32, %c0_i32_0 : i32, i32
  }
  func.func @transform_8(%arg0: i32, %arg1: i32) -> (i32, i32, i32, i32) {
    %c0_i32 = arith.constant 0 : i32
    %c0_i32_0 = arith.constant 0 : i32
    %c0_i32_1 = arith.constant 0 : i32
    return %arg0, %arg1, %c0_i32, %c0_i32_0 : i32, i32, i32, i32
  }
}

</mosaic_0001>

<bundles_post_ra>
// kernel: psp_module_forward.1
= control target key start
LH: loop header
LB: loop body
LE: loop exit
PB: predicated region body
PF: predicated region fallthrough
CT: control target
= control target key end

     0   :  { %s3248_s27 = smov 0   ;;  %s3250_s28 = smov 0   ;;  %s4076_s0 = inlined_call_operand.vmem [shape: bf16[2,16,16,16], index: 0, kind: input, shape index: {}]   ;;  %s4077_s1 = inlined_call_operand.vmem [shape: bf16[50,256], index: 1, kind: input, shape index: {}]   ;;  %s4078_s2 = inlined_call_operand.vmem [shape: bf16[16,16], index: 2, kind: input, shape index: {}]   ;;  %s4079_s3 = inlined_call_operand.vmem [shape: f32[1,16], index: 3, kind: input, shape index: {}]   ;;  %s4080_s4 = inlined_call_operand.vmem [shape: f32[50,16], index: 4, kind: input, shape index: {}]   ;;  %s4081_s5 = inlined_call_operand.vmem [shape: bf16[256,50], index: 5, kind: input, shape index: {}]   ;;  %s4082_s6 = inlined_call_operand.vmem [shape: bf16[3,32,384], index: 6, kind: input, shape index: {}]   ;;  %s4083_s7 = inlined_call_operand.vmem [shape: f32[1,128], index: 7, kind: input, shape index: {}]   ;;  %s4084_s8 = inlined_call_operand.vmem [shape: f32[2,16,16,128], index: 8, kind: output, shape index: {}]  }
   0x1   :  { %s3252_s29 = smov 0   ;;  %s3254_s30 = smov 0  }
   0x2   :  { %s3256_s9 = smov 0  }
   0x3 LB: > { %s27_s10 = sadd.s32 1, %s3189_s29  ;;  %s30_s11 = sadd.s32 1, %s3193_s30  ;;  %s3197_s9 = sphi %s3256_s9, %s18_s9   ;;  %s3193_s30 = sphi %s3254_s30, %s4088_s30   ;;  %s3189_s29 = sphi %s3252_s29, %s4087_s29   ;;  %s3185_s28 = sphi %s3250_s28, %s4086_s28   ;;  %s3181_s27 = sphi %s3248_s27, %s4085_s27  }
   0x4   : > { %p28_p0 = scmp.ge.s32.totalorder %s27_s10, 2  ;;  %p2550_p1 = scmp.ge.s32.totalorder %s3197_s9, 1 }
   0x5   : > { %p276_p2 = scmp.lt.s32.totalorder %s3197_s9, 5 }
   0x6   : > { %s4090_s10 = smov (%p28_p0, %s27_s10), 0  ;;  %s4092_s11 = smov (!%p28_p0, %s30_s11), %s3193_s30 }
   0x7   : > { %p277_p3 = pnand %p2550_p1, %p276_p2  ;;  %p32_p4 = scmp.ge.s32.totalorder %s4092_s11, 2 }
   0x8   : > { %p315_p5 = scmp.lt.s32.totalorder (!%p277_p3), %s3185_s28, 1  ;;  %s3281_s12 = sshll.u32 (!%p277_p3), %s3181_s27, 3 }
   0x9   : > { %s4094_s11 = smov (%p32_p4, %s4092_s11), 0  ;;  %280 = sbr.rel (%p277_p3) target bundleno = 1712 (0x6b0), region = 52 }
   0xa   : > { %p323_p6 = scmp.lt.s32.totalorder (!%p277_p3), %s3281_s12, 15  ;;  %p2557_p7 = scmp.ne.s32.totalorder (!%p277_p3), %s3181_s27, 0 }
   0xe   : > { %s4096_s28 = smov (!%p315_p5, %s3185_s28), 1 }
   0xf   : > { %s324_s13 = scalar_select %p323_p6, %s3281_s12, 15 }
  0x10   : > { %s2992_s14 = sshll.u32 %s4096_s28, 7  ;;  %s2555_s15 = sshll.u32 %s4096_s28, 5 }
  0x11   : > { %s3288_s18 = scalar_lea.vmem %s4076_s0, %s2992_s14  ;;  %s2554_s19 = sshll.u32 %s324_s13, 1 }
  0x12   : > { %s327_s20 = sadd.s32 %s2555_s15, %s2554_s19  ;;  %335 = sbr.rel (%p2557_p7) target bundleno = 414 (0x19e), region = 56 }
  0x13   : > { %s2556_s21 = sshll.u32 %s327_s20, 3 }
  0x14   : > { %s3293_s24 = scalar_lea.vmem %s4084_s8, %s2556_s21 }
  0x17   : > { %v3000_v0 = vld [vmem:[%s3288_s18 + $0x38] sm:$0xff]  ;;  %v2999_v1 = vld [vmem:[%s3288_s18 + $0x30] sm:$0xff]  ;;  %v2998_v3 = vld [vmem:[%s3288_s18 + $0x28] sm:$0xff]  ;;  %vm580_vm0 = vcmask 130048   ;;  %vm649_vm1 = vcmask 125952   ;;  %vm656_vm2 = vcmask 122880  }
  0x18   : > { %508 = vmatpush.bf16.msra.mxu0 %v3000_v0  ;;  %v3008_v2 = vld [vmem:[%s3288_s18 + $0x78] sm:$0xff]  ;;  %3079 = vmatpush.bf16.msra.mxu3 %v3000_v0  ;;  %v3007_v4 = vld [vmem:[%s3288_s18 + $0x70] sm:$0xff]  ;;  %v2997_v5 = vld [vmem:[%s3288_s18 + $0x20] sm:$0xff] }
  0x19   : > { %3087 = vmatpush.bf16.msra.mxu1 %v3008_v2  ;;  %v3006_v6 = vld [vmem:[%s3288_s18 + $0x68] sm:$0xff]  ;;  %v2996_v7 = vld [vmem:[%s3288_s18 + $0x18] sm:$0xff]  ;;  %v3005_v8 = vld [vmem:[%s3288_s18 + $0x60] sm:$0xff] }
  0x1a   : > { %v2995_v9 = vld [vmem:[%s3288_s18 + $0x10] sm:$0xff]  ;;  %v3004_v10 = vld [vmem:[%s3288_s18 + $0x58] sm:$0xff]  ;;  %v2994_v11 = vld [vmem:[%s3288_s18 + $0x8] sm:$0xff] }
  0x1b   : > { %v3003_v12 = vld [vmem:[%s3288_s18 + $0x50] sm:$0xff]  ;;  %v2993_v13 = vld [vmem:[%s3288_s18] sm:$0xff]  ;;  %v3010_v15 = vld [vmem:[%s4077_s1 + $0x4] sm:$0xf0] }
  0x1c   : > { %509 = vmatpush.bf16.msra.mxu0 %v2999_v1  ;;  %3080 = vmatpush.bf16.msra.mxu3 %v2999_v1  ;;  %v2560_v14 = vld [vmem:[%s4077_s1] sm:$0xf]  ;;  %v3002_v16 = vld [vmem:[%s3288_s18 + $0x48] sm:$0xff]  ;;  %v2568_v18 = vld [vmem:[%s4077_s1 + $0x10] sm:$0xf] }
  0x1d   : > { %3088 = vmatpush.bf16.msra.mxu1 %v3007_v4  ;;  %v2561_v17 = vor.u32 %v3010_v15, %v2560_v14  ;;  %v3012_v19 = vld [vmem:[%s4077_s1 + $0x14] sm:$0xf0]  ;;  %v3001_v20 = vld [vmem:[%s3288_s18 + $0x40] sm:$0xff]  ;;  %v3011_v22 = vld [vmem:[%s4077_s1 + $0x14] sm:$0xf] }
  0x1e   : > { %v2569_v21 = vor.u32 %v3012_v19, %v2568_v18  ;;  %v2570_v23 = vld [vmem:[%s4077_s1 + $0x18] sm:$0xf0]  ;;  %v2576_v25 = vld [vmem:[%s4077_s1 + $0x20] sm:$0xf]  ;;  %v3014_v26 = vld [vmem:[%s4077_s1 + $0x24] sm:$0xf0] }
  0x1f   : > { %v2573_v24 = vor.u32 %v3011_v22, %v2570_v23  ;;  %v3013_v27 = vld [vmem:[%s4077_s1 + $0x24] sm:$0xf]  ;;  %v2578_v28 = vld [vmem:[%s4077_s1 + $0x28] sm:$0xf0]  ;;  %v2577_v29 = vor.u32 %v3014_v26, %v2576_v25  ;;  %v374_v31 = vld [vmem:[%s4077_s1 + $0x30] sm:$0x11] }
  0x20   : > { %510 = vmatpush.bf16.msra.mxu0 %v2998_v3  ;;  %3081 = vmatpush.bf16.msra.mxu3 %v2998_v3  ;;  %v2581_v30 = vor.u32 %v3013_v27, %v2578_v28  ;;  %v3009_v32 = vld [vmem:[%s4077_s1 + $0x4] sm:$0xf]  ;;  %v2562_v33 = vld [vmem:[%s4077_s1 + $0x8] sm:$0xf0]  ;;  %v394_v34 = vunpack.c.l.b16 %v374_v31  ;;  %v395_v36 = vunpack.c.h.b16 %v374_v31  ;;  %v3157_v3 = vld [vmem:[%s4079_s3] ss:$0 sm:$0xff] }
  0x21   : > { %3089 = vmatpush.bf16.msra.mxu1 %v3006_v6  ;;  %v2565_v35 = vor.u32 %v3009_v32, %v2562_v33  ;;  %v3015_v40 = vld [vmem:[%s4078_s2] sm:$0xff]  ;;  %v630_v18 = vld [vmem:[%s4080_s4 + $0x10] sm:$0xff] }
  0x22   : > { %v402_v37 = vpack.c.b16 %v394_v34, %v394_v34  ;;  %v403_v38 = vpack.c.b16 %v395_v36, %v395_v36  ;;  %600 = vmatpush.bf16.msra.mxu2 %v3015_v40  ;;  %v633_v36 = vld [vmem:[%s4080_s4 + $0x28] sm:$0xff] }
  0x24   : > { %511 = vmatpush.bf16.msra.mxu0 %v2997_v5  ;;  %3082 = vmatpush.bf16.msra.mxu3 %v2997_v5 }
  0x25   : > { %3090 = vmatpush.bf16.msra.mxu1 %v3005_v8 }
  0x28   : > { %512 = vmatpush.bf16.msra.mxu0 %v2996_v7  ;;  %3083 = vmatpush.bf16.msra.mxu3 %v2996_v7 }
  0x29   : > { %3091 = vmatpush.bf16.msra.mxu1 %v3004_v10 }
  0x2c   : > { %513 = vmatpush.bf16.msra.mxu0 %v2995_v9  ;;  %3084 = vmatpush.bf16.msra.mxu3 %v2995_v9 }
  0x2d   : > { %3092 = vmatpush.bf16.msra.mxu1 %v3003_v12 }
  0x30   : > { %514 = vmatpush.bf16.msra.mxu0 %v2994_v11  ;;  %3085 = vmatpush.bf16.msra.mxu3 %v2994_v11 }
  0x31   : > { %3093 = vmatpush.bf16.msra.mxu1 %v3002_v16 }
  0x34   : > { %515 = vmatpush.bf16.msra.mxu0 %v2993_v13  ;;  %3086 = vmatpush.bf16.msra.mxu3 %v2993_v13 }
  0x35   : > { %3094 = vmatpush.bf16.msra.mxu1 %v3001_v20 }
  0x37   : > { %516 = vmatmul.bf16.vlgmr.msra.gmra.mxu0 %v2561_v17  ;;  %521 = vmatmul.bf16.vlgmr.msra.gmra.mxu3 %v2569_v21 }
  0x38   : > { %536 = vmatpush.bf16.msrb.mxu0 %v3008_v2  ;;  %549 = vmatmul.bf16.vlgmr.msra.gmra.mxu1 %v2573_v24  ;;  %v631_v24 = vld [vmem:[%s4080_s4 + $0x18] sm:$0xff] }
  0x3c   : > { %537 = vmatpush.bf16.msrb.mxu0 %v3007_v4 }
  0x40   : > { %538 = vmatpush.bf16.msrb.mxu0 %v3006_v6  ;;  %v628_v6 = vld [vmem:[%s4080_s4] sm:$0xff] }
  0x44   : > { %539 = vmatpush.bf16.msrb.mxu0 %v3005_v8 }
  0x47   : > { %526 = vmatmul.bf16.gmra.mxu3 %v2577_v29 }
  0x48   : > { %540 = vmatpush.bf16.msrb.mxu0 %v3004_v10  ;;  %554 = vmatmul.bf16.gmra.mxu1 %v2581_v30  ;;  %v632_v30 = vld [vmem:[%s4080_s4 + $0x20] sm:$0xff] }
  0x4c   : > { %541 = vmatpush.bf16.msrb.mxu0 %v3003_v12  ;;  %v629_v12 = vld [vmem:[%s4080_s4 + $0x8] sm:$0xff] }
  0x50   : > { %542 = vmatpush.bf16.msrb.mxu0 %v3002_v16 }
  0x54   : > { %543 = vmatpush.bf16.msrb.mxu0 %v3001_v20 }
  0x57   : > { %544 = vmatmul.bf16.vlgmr.msrb.gmra.mxu0 %v2565_v35  ;;  %531 = vmatmul.bf16.gmra.mxu3 %v402_v37 }
  0x58   : > { %559 = vmatmul.bf16.gmra.mxu1 %v403_v38 }
  0xb4   : > { %v517_v42 = vpop.f32.mrf.mxu0 }
  0xb5   : > { %v550_v39 = vpop.f32.mrf.mxu1 }
  0xba   : > { %v522_v41 = vpop.f32.mrf.mxu3 }
  0xbb   : > { %v551_v59 = vadd.f32 %v550_v39, %v522_v41 }
  0xbc   : > { %v519_v45 = vpop.f32.mrf.mxu0 }
  0xbd   : > { %v552_v44 = vpop.f32.mrf.mxu1 }
  0xc2   : > { %v524_v43 = vpop.f32.mrf.mxu3 }
  0xc3   : > { %v553_v60 = vadd.f32 %v552_v44, %v524_v43 }
  0xc5   : > { %v555_v47 = vpop.f32.mrf.mxu1  ;;  %v565_v61 = vpack.c.bf16 %v553_v60, %v551_v59 }
  0xca   : > { %v527_v46 = vpop.f32.mrf.mxu3 }
  0xcb   : > { %v556_v62 = vadd.f32 %v555_v47, %v527_v46 }
  0xcd   : > { %v557_v50 = vpop.f32.mrf.mxu1 }
  0xd2   : > { %v529_v49 = vpop.f32.mrf.mxu3 }
  0xd3   : > { %v558_v63 = vadd.f32 %v557_v50, %v529_v49 }
  0xd4   : > { %v545_v48 = vpop.f32.mrf.mxu0 }
  0xd5   : > { %v546_v52 = vadd.f32 %v545_v48, %v517_v42  ;;  %v560_v56 = vpop.f32.mrf.mxu1  ;;  %v566_v0 = vpack.c.bf16 %v558_v63, %v556_v62  ;;  %v634_v42 = vld [vmem:[%s4080_s4 + $0x30] sm:$0x3] }
  0xda   : > { %v532_v55 = vpop.f32.mrf.mxu3 }
  0xdb   : > { %v561_v1 = vadd.f32 %v560_v56, %v532_v55 }
  0xdc   : > { %v547_v51 = vpop.f32.mrf.mxu0 }
  0xdd   : > { %v548_v53 = vadd.f32 %v547_v51, %v519_v45  ;;  %v562_v58 = vpop.f32.mrf.mxu1  ;;  %v567_v2 = vpack.c.bf16 %v561_v1, %v561_v1 }
  0xdf   : > { %v564_v54 = vpack.c.bf16 %v548_v53, %v546_v52 }
  0xe1   : > { %2650 = vmatmul.msk.bf16.vlgmr.msra.gmra.mxu2 %vm580_vm0, %v564_v54 }
  0xe2   : > { %v534_v57 = vpop.f32.mrf.mxu3 }
  0xf1   : > { %2651 = vmatmul.msk.bf16.gmra.mxu2 %vm580_vm0, %v565_v61 }
 0x101   : > { %2652 = vmatmul.msk.bf16.gmra.mxu2 %vm580_vm0, %v566_v0 }
 0x111   : > { %2653 = vmatmul.msk.bf16.gmra.mxu2 %vm580_vm0, %v567_v2 }
 0x164   : > { %v602_v4 = vpop.f32.mrf.mxu2 }
 0x165   : > { %v603_v5 = vadd.f32 %v3157_v3, %v602_v4 }
 0x167   : > { %v621_v7 = vmax.f32 %v603_v5, 0.0 }
 0x169   : > { %v635_v8 = vmul.f32 %v628_v6, %v621_v7 }
 0x16b   : > { %v642_v9 = vpack.c.bf16 %v635_v8, %v635_v8 }
 0x16c   : > { %v604_v10 = vpop.f32.mrf.mxu2 }
 0x16d   : > { %650 = vst.msk [vmem:[#allocation2] sm:$0xf] %vm649_vm1, %v642_v9  ;;  %v605_v11 = vadd.f32 %v3157_v3, %v604_v10 }
 0x16f   : > { %v622_v13 = vmax.f32 %v605_v11, 0.0 }
 0x171   : > { %v636_v14 = vmul.f32 %v629_v12, %v622_v13 }
 0x173   : > { %v643_v15 = vpack.c.bf16 %v636_v14, %v636_v14 }
 0x174   : > { %v607_v16 = vpop.f32.mrf.mxu2 }
 0x175   : > { %651 = vst.msk [vmem:[#allocation2 + $0x4] sm:$0xf] %vm649_vm1, %v643_v15  ;;  %v608_v17 = vadd.f32 %v3157_v3, %v607_v16 }
 0x177   : > { %v623_v19 = vmax.f32 %v608_v17, 0.0 }
 0x179   : > { %v637_v20 = vmul.f32 %v630_v18, %v623_v19 }
 0x17b   : > { %v644_v21 = vpack.c.bf16 %v637_v20, %v637_v20 }
 0x17c   : > { %v609_v22 = vpop.f32.mrf.mxu2 }
 0x17d   : > { %652 = vst.msk [vmem:[#allocation2 + $0x8] sm:$0xf] %vm649_vm1, %v644_v21  ;;  %v610_v23 = vadd.f32 %v3157_v3, %v609_v22 }
 0x17f   : > { %v624_v25 = vmax.f32 %v610_v23, 0.0 }
 0x181   : > { %v638_v26 = vmul.f32 %v631_v24, %v624_v25 }
 0x183   : > { %v645_v27 = vpack.c.bf16 %v638_v26, %v638_v26 }
 0x184   : > { %v612_v28 = vpop.f32.mrf.mxu2 }
 0x185   : > { %653 = vst.msk [vmem:[#allocation2 + $0xc] sm:$0xf] %vm649_vm1, %v645_v27  ;;  %v613_v29 = vadd.f32 %v3157_v3, %v612_v28 }
 0x187   : > { %v625_v31 = vmax.f32 %v613_v29, 0.0 }
 0x189   : > { %v639_v32 = vmul.f32 %v632_v30, %v625_v31 }
 0x18b   : > { %v646_v33 = vpack.c.bf16 %v639_v32, %v639_v32 }
 0x18c   : > { %v614_v34 = vpop.f32.mrf.mxu2 }
 0x18d   : > { %654 = vst.msk [vmem:[#allocation2 + $0x10] sm:$0xf] %vm649_vm1, %v646_v33  ;;  %v615_v35 = vadd.f32 %v3157_v3, %v614_v34 }
 0x18f   : > { %v626_v37 = vmax.f32 %v615_v35, 0.0 }
 0x191   : > { %v640_v38 = vmul.f32 %v633_v36, %v626_v37 }
 0x193   : > { %v647_v39 = vpack.c.bf16 %v640_v38, %v640_v38 }
 0x194   : > { %v617_v40 = vpop.f32.mrf.mxu2 }
 0x195   : > { %655 = vst.msk [vmem:[#allocation2 + $0x14] sm:$0xf] %vm649_vm1, %v647_v39  ;;  %v618_v41 = vadd.f32 %v3157_v3, %v617_v40 }
 0x197   : > { %v627_v43 = vmax.f32 %v618_v41, 0.0 }
 0x199   : > { %v641_v44 = vmul.f32 %v634_v42, %v627_v43 }
 0x19b   : > { %v648_v45 = vpack.c.bf16 %v641_v44, %v641_v44 }
 0x19c   : > { %v619_v46 = vpop.f32.mrf.mxu2 }
 0x19d   : > { %657 = vst.msk [vmem:[#allocation2 + $0x18] sm:$0x1] %vm656_vm2, %v648_v45 }
 0x19e PF: > { %vm666_vm3 = vcmask 257024   ;;  %v3199_v48 = vmov 0   ;;  %vm816_vm4 = vcmask 1040384   ;;  %s3021_s15 = sshll.u32 %s3181_s27, 7  ;;  %v3394_v52 = vld [vmem:[#allocation2 + $0x10] sm:$0xff]  ;;  %v3402_v53 = vld [vmem:[#allocation2 + $0x8] sm:$0xff] }
 0x19f   : > { %667 = vst.msk [vmem:[#allocation3] sm:$0xf] %vm666_vm3, %v3199_v48  ;;  %s710_s16 = sshra.s32 %s3021_s15, 3  ;;  %v3408_v54 = vld [vmem:[#allocation2] sm:$0xff]  ;;  %vm791_vm5 = vcmask 408576   ;;  %s3200_s22 = smov 16  }
 0x1a0   : > { %668 = vst.msk [vmem:[#allocation3 + $0x4] sm:$0xf] %vm666_vm3, %v3199_v48  ;;  %s2658_s17 = sshll.u32 %s710_s16, 2  ;;  %s3020_s23 = sshll.u32 %s3181_s27, 6  ;;  %vm692_vm6 = vcmask 125952   ;;  %vm949_vm7 = vcmask 257152  }
 0x1a1   : > { %670 = vst.msk [vmem:[#allocation3 + $0x48] sm:$0xf] %vm666_vm3, %v3199_v48  ;;  %s713_s21 = scalar_lea.vmem %s4081_s5, %s2658_s17  ;;  %s3435_s25 = scalar_lea.vmem %s3288_s18, %s3020_s23 }
 0x1a2   : > { %671 = vst.msk [vmem:[#allocation3 + $0x4c] sm:$0xf] %vm666_vm3, %v3199_v48  ;;  %v3022_v55 = vld [vmem:[%s713_s21] sm:$0xff]  ;;  %v3024_v56 = vld [vmem:[%s713_s21 + $0x10] sm:$0xff]  ;;  %v3023_v59 = vld [vmem:[%s713_s21 + $0x8] sm:$0xff]  ;;  %p2711_p8 = scmp.le.s32.totalorder %s3181_s27, 0 }
 0x1a3   : > { %v3026_v57 = vld [vmem:[%s713_s21 + $0x20] sm:$0xff]  ;;  %v3028_v58 = vld [vmem:[%s713_s21 + $0x30] sm:$0xff]  ;;  %v3025_v60 = vld [vmem:[%s713_s21 + $0x18] sm:$0xff]  ;;  %s2712_s26 = sadd.s32 (!%p2711_p8), 4294967295, %s3281_s12  ;;  %s3201_s12 = smov (!%p2711_p8), 16  }
 0x1a4   : > { %v664_v47 = vld [vmem:[#allocation2 + $0x18] sm:$0x1]  ;;  %v3027_v61 = vld [vmem:[%s713_s21 + $0x28] sm:$0xff]  ;;  %v679_v15 = vld [vmem:[%s3435_s25 + $0x10] sm:$0xf]  ;;  %s2715_s28 = sshll.u32 (!%p2711_p8), %s2712_s26, 4 }
 0x1a5   : > { %v783_v49 = vunpack.c.l.b16 %v664_v47  ;;  %v3029_v62 = vld [vmem:[%s713_s21 + $0x38] sm:$0xff]  ;;  %697 = vst.msk [vmem:[#allocation3 + $0x18] sm:$0xf] %vm692_vm6, %v679_v15  ;;  %v683_v32 = vld [vmem:[%s3435_s25 + $0x20] sm:$0xf]  ;;  %s979_s13 = sshra.s32 (!%p2711_p8), %s2715_s28, 3 }
 0x1a6   : > { %701 = vst.msk [vmem:[#allocation3 + $0x28] sm:$0xf] %vm692_vm6, %v683_v32  ;;  %v680_v33 = vld [vmem:[%s3435_s25 + $0x14] sm:$0xf]  ;;  %v675_v34 = vld [vmem:[%s3435_s25] sm:$0xf] }
 0x1a7   : > { %v787_v50 = vpack.c.b16 %v783_v49, %v783_v49  ;;  %698 = vst.msk [vmem:[#allocation3 + $0x1c] sm:$0xf] %vm692_vm6, %v680_v33  ;;  %v686_v35 = vld [vmem:[%s3435_s25 + $0x2c] sm:$0xf]  ;;  %v687_v37 = vld [vmem:[%s3435_s25 + $0x30] sm:$0xf] }
 0x1a8   : > { %693 = vst.msk [vmem:[#allocation3 + $0x8] sm:$0xf] %vm692_vm6, %v675_v34  ;;  %v689_v38 = vld [vmem:[%s3435_s25 + $0x38] sm:$0xf]  ;;  %v676_v40 = vld [vmem:[%s3435_s25 + $0x4] sm:$0xf] }
 0x1a9   : > { %v3389_v51 = vsel %vm816_vm4, %v787_v50, 0  ;;  %704 = vst.msk [vmem:[#allocation3 + $0x34] sm:$0xf] %vm692_vm6, %v686_v35  ;;  %v677_v41 = vld [vmem:[%s3435_s25 + $0x8] sm:$0xf]  ;;  %s2716_s14 = sshll.u32 (!%p2711_p8), %s979_s13, 2 }
 0x1aa   : > { %824 = vmatpush.bf16.msra.mxu0 %v3389_v51  ;;  %3095 = vmatpush.bf16.msra.mxu1 %v3389_v51  ;;  %705 = vst.msk [vmem:[#allocation3 + $0x38] sm:$0xf] %vm692_vm6, %v687_v37  ;;  %v684_v42 = vld [vmem:[%s3435_s25 + $0x24] sm:$0xf]  ;;  %v685_v44 = vld [vmem:[%s3435_s25 + $0x28] sm:$0xf]  ;;  %s982_s19 = scalar_lea.vmem (!%p2711_p8), %s4081_s5, %s2716_s14 }
 0x1ab   : > { %3096 = vmatpush.bf16.msra.mxu2 %v3389_v51  ;;  %3097 = vmatpush.bf16.msra.mxu3 %v3389_v51  ;;  %707 = vst.msk [vmem:[#allocation3 + $0x40] sm:$0xf] %vm692_vm6, %v689_v38  ;;  %v681_v45 = vld [vmem:[%s3435_s25 + $0x18] sm:$0xf]  ;;  %v678_v47 = vld [vmem:[%s3435_s25 + $0xc] sm:$0xf] }
 0x1ac   : > { %694 = vst.msk [vmem:[#allocation3 + $0xc] sm:$0xf] %vm692_vm6, %v676_v40  ;;  %v690_v48 = vld [vmem:[%s3435_s25 + $0x3c] sm:$0xf]  ;;  %s3030_s20 = sshll.u32 (!%p2711_p8), %s2712_s26, 3 }
 0x1ad   : > { %695 = vst.msk [vmem:[#allocation3 + $0x10] sm:$0xf] %vm692_vm6, %v677_v41  ;;  %s973_s21 = scalar_lea.vmem (!%p2711_p8), %s3288_s18, %s3030_s20 }
 0x1ae   : > { %825 = vmatpush.bf16.msra.mxu0 %v3394_v52  ;;  %3098 = vmatpush.bf16.msra.mxu1 %v3394_v52  ;;  %702 = vst.msk [vmem:[#allocation3 + $0x2c] sm:$0xf] %vm692_vm6, %v684_v42 }
 0x1af   : > { %3099 = vmatpush.bf16.msra.mxu2 %v3394_v52  ;;  %3100 = vmatpush.bf16.msra.mxu3 %v3394_v52  ;;  %703 = vst.msk [vmem:[#allocation3 + $0x30] sm:$0xf] %vm692_vm6, %v685_v44 }
 0x1b0   : > { %699 = vst.msk [vmem:[#allocation3 + $0x20] sm:$0xf] %vm692_vm6, %v681_v45 }
 0x1b1   : > { %696 = vst.msk [vmem:[#allocation3 + $0x14] sm:$0xf] %vm692_vm6, %v678_v47 }
 0x1b2   : > { %826 = vmatpush.bf16.msra.mxu0 %v3402_v53  ;;  %3101 = vmatpush.bf16.msra.mxu1 %v3402_v53  ;;  %708 = vst.msk [vmem:[#allocation3 + $0x44] sm:$0xf] %vm692_vm6, %v690_v48 }
 0x1b3   : > { %3102 = vmatpush.bf16.msra.mxu2 %v3402_v53  ;;  %3103 = vmatpush.bf16.msra.mxu3 %v3402_v53 }
 0x1b6   : > { %827 = vmatpush.bf16.msra.mxu0 %v3408_v54  ;;  %3104 = vmatpush.bf16.msra.mxu1 %v3408_v54 }
 0x1b7   : > { %3105 = vmatpush.bf16.msra.mxu2 %v3408_v54  ;;  %3106 = vmatpush.bf16.msra.mxu3 %v3408_v54 }
 0x1b9   : > { %2703 = vmatmul.msk.bf16.vlgmr.msra.gmra.mxu0 %vm791_vm5, %v3022_v55  ;;  %2705 = vmatmul.msk.bf16.vlgmr.msra.gmra.mxu1 %vm791_vm5, %v3024_v56  ;;  %v682_v55 = vld [vmem:[%s3435_s25 + $0x1c] sm:$0xf]  ;;  %v688_v56 = vld [vmem:[%s3435_s25 + $0x34] sm:$0xf] }
 0x1ba   : > { %2707 = vmatmul.msk.bf16.vlgmr.msra.gmra.mxu2 %vm791_vm5, %v3026_v57  ;;  %2709 = vmatmul.msk.bf16.vlgmr.msra.gmra.mxu3 %vm791_vm5, %v3028_v58  ;;  %700 = vst.msk [vmem:[#allocation3 + $0x24] sm:$0xf] %vm692_vm6, %v682_v55 }
 0x1bb   : > { %706 = vst.msk [vmem:[#allocation3 + $0x3c] sm:$0xf] %vm692_vm6, %v688_v56 }
 0x1c9   : > { %2704 = vmatmul.msk.bf16.gmra.mxu0 %vm791_vm5, %v3023_v59  ;;  %2706 = vmatmul.msk.bf16.gmra.mxu1 %vm791_vm5, %v3025_v60 }
 0x1ca   : > { %2708 = vmatmul.msk.bf16.gmra.mxu2 %vm791_vm5, %v3027_v61  ;;  %2710 = vmatmul.msk.bf16.gmra.mxu3 %vm791_vm5, %v3029_v62 }
 0x236   : > { %v829_v63 = vpop.f32.mrf.mxu0  ;;  %v839_v0 = vpop.f32.mrf.mxu1 }
 0x237   : > { %v869_v1 = vpack.c.bf16 %v829_v63, %v829_v63  ;;  %v873_v2 = vpack.c.bf16 %v839_v0, %v839_v0 }
 0x239   : > { %909 = vrot.lane.b32.xlu2 %v873_v2, %s3200_s22  ;;  %901 = vrot.lane.b32.xlu0 %v869_v1, %s3200_s22 }
 0x23d   : > { %v849_v3 = vpop.f32.mrf.mxu2  ;;  %v859_v4 = vpop.f32.mrf.mxu3 }
 0x23e   : > { %v877_v5 = vpack.c.bf16 %v849_v3, %v849_v3  ;;  %v831_v6 = vpop.f32.mrf.mxu0  ;;  %v881_v7 = vpack.c.bf16 %v859_v4, %v859_v4  ;;  %v841_v8 = vpop.f32.mrf.mxu1 }
 0x23f   : > { %v874_v10 = vpack.c.bf16 %v841_v8, %v841_v8  ;;  %v870_v12 = vpack.c.bf16 %v831_v6, %v831_v6 }
 0x241   : > { %917 = vrot.lane.b32.xlu2 %v877_v5, %s3200_s22  ;;  %925 = vrot.lane.b32.xlu0 %v881_v7, %s3200_s22 }
 0x245   : > { %v851_v9 = vpop.f32.mrf.mxu2  ;;  %v861_v14 = vpop.f32.mrf.mxu3 }
 0x246   : > { %v834_v11 = vpop.f32.mrf.mxu0  ;;  %v878_v18 = vpack.c.bf16 %v851_v9, %v851_v9  ;;  %v844_v20 = vpop.f32.mrf.mxu1  ;;  %v882_v31 = vpack.c.bf16 %v861_v14, %v861_v14 }
 0x247   : > { %v871_v13 = vpack.c.bf16 %v834_v11, %v834_v11  ;;  %v875_v22 = vpack.c.bf16 %v844_v20, %v844_v20 }
 0x249   : > { %911 = vrot.lane.b32.xlu2 %v874_v10, %s3200_s22  ;;  %903 = vrot.lane.b32.xlu0 %v870_v12, %s3200_s22 }
 0x24a   : > { %905 = vrot.lane.b32.xlu1 %v871_v13, %s3200_s22 }
 0x24d   : > { %v854_v16 = vpop.f32.mrf.mxu2  ;;  %v864_v19 = vpop.f32.mrf.mxu3 }
 0x24e   : > { %v879_v17 = vpack.c.bf16 %v854_v16, %v854_v16  ;;  %v836_v21 = vpop.f32.mrf.mxu0  ;;  %v883_v27 = vpack.c.bf16 %v864_v19, %v864_v19  ;;  %v846_v28 = vpop.f32.mrf.mxu1 }
 0x24f   : > { %v872_v25 = vpack.c.bf16 %v836_v21, %v836_v21  ;;  %v876_v30 = vpack.c.bf16 %v846_v28, %v846_v28 }
 0x251   : > { %919 = vrot.lane.b32.xlu0 %v878_v18, %s3200_s22 }
 0x252   : > { %921 = vrot.lane.b32.xlu1 %v879_v17, %s3200_s22 }
 0x255   : > { %v856_v23 = vpop.f32.mrf.mxu2  ;;  %v866_v26 = vpop.f32.mrf.mxu3 }
 0x256   : > { %v880_v24 = vpack.c.bf16 %v856_v23, %v856_v23  ;;  %v884_v29 = vpack.c.bf16 %v866_v26, %v866_v26 }
 0x258   : > { %923 = vrot.lane.b32.xlu2 %v880_v24, %s3200_s22 }
 0x259   : > { %913 = vrot.lane.b32.xlu0 %v875_v22, %s3200_s22 }
 0x25a   : > { %907 = vrot.lane.b32.xlu1 %v872_v25, %s3200_s22 }
 0x260   : > { %929 = vrot.lane.b32.xlu2 %v883_v27, %s3200_s22 }
 0x261   : > { %931 = vrot.lane.b32.xlu0 %v884_v29, %s3200_s22 }
 0x262   : > { %915 = vrot.lane.b32.xlu1 %v876_v30, %s3200_s22 }
 0x26a   : > { %927 = vrot.lane.b32.xlu1 %v882_v31, %s3200_s22 }
 0x293   : > { %v910_v36 = vpop.permute.xlu2 %909 }
 0x294   : > { %954 = vst.msk [vmem:[#allocation3 + $0x18] sm:$0xf] %vm949_vm7, %v910_v36 }
 0x29b   : > { %v918_v39 = vpop.permute.xlu2 %917 }
 0x29c   : > { %958 = vst.msk [vmem:[#allocation3 + $0x28] sm:$0xf] %vm949_vm7, %v918_v39 }
 0x2a3   : > { %v912_v43 = vpop.permute.xlu2 %911 }
 0x2a4   : > { %955 = vst.msk [vmem:[#allocation3 + $0x1c] sm:$0xf] %vm949_vm7, %v912_v43 }
 0x2ab   : > { %v902_v46 = vpop.permute.xlu0 %901 }
 0x2ac   : > { %950 = vst.msk [vmem:[#allocation3 + $0x8] sm:$0xf] %vm949_vm7, %v902_v46 }
 0x2b2   : > { %v924_v49 = vpop.permute.xlu2 %923 }
 0x2b3   : > { %961 = vst.msk [vmem:[#allocation3 + $0x34] sm:$0xf] %vm949_vm7, %v924_v49  ;;  %v926_v50 = vpop.permute.xlu0 %925 }
 0x2b4   : > { %962 = vst.msk [vmem:[#allocation3 + $0x38] sm:$0xf] %vm949_vm7, %v926_v50 }
 0x2ba   : > { %v930_v57 = vpop.permute.xlu2 %929 }
 0x2bb   : > { %964 = vst.msk [vmem:[#allocation3 + $0x40] sm:$0xf] %vm949_vm7, %v930_v57  ;;  %v904_v58 = vpop.permute.xlu0 %903 }
 0x2bc   : > { %951 = vst.msk [vmem:[#allocation3 + $0xc] sm:$0xf] %vm949_vm7, %v904_v58  ;;  %v906_v59 = vpop.permute.xlu1 %905 }
 0x2bd   : > { %952 = vst.msk [vmem:[#allocation3 + $0x10] sm:$0xf] %vm949_vm7, %v906_v59 }
 0x2c3   : > { %v920_v60 = vpop.permute.xlu0 %919 }
 0x2c4   : > { %959 = vst.msk [vmem:[#allocation3 + $0x2c] sm:$0xf] %vm949_vm7, %v920_v60  ;;  %v922_v61 = vpop.permute.xlu1 %921 }
 0x2c5   : > { %960 = vst.msk [vmem:[#allocation3 + $0x30] sm:$0xf] %vm949_vm7, %v922_v61 }
 0x2cb   : > { %v914_v62 = vpop.permute.xlu0 %913 }
 0x2cc   : > { %956 = vst.msk [vmem:[#allocation3 + $0x20] sm:$0xf] %vm949_vm7, %v914_v62  ;;  %v908_v63 = vpop.permute.xlu1 %907 }
 0x2cd   : > { %953 = vst.msk [vmem:[#allocation3 + $0x14] sm:$0xf] %vm949_vm7, %v908_v63 }
 0x2d3   : > { %v932_v0 = vpop.permute.xlu0 %931 }
 0x2d4   : > { %965 = vst.msk [vmem:[#allocation3 + $0x44] sm:$0xf] %vm949_vm7, %v932_v0  ;;  %v916_v1 = vpop.permute.xlu1 %915 }
 0x2d5   : > { %957 = vst.msk [vmem:[#allocation3 + $0x24] sm:$0xf] %vm949_vm7, %v916_v1 }
 0x2d9   : > { %969 = sbr.rel (%p2711_p8) target bundleno = 1001 (0x3e9), region = 60 }
 0x2dc   : > { %v928_v2 = vpop.permute.xlu1 %927 }
 0x2dd   : > { %963 = vst.msk [vmem:[#allocation3 + $0x3c] sm:$0xf] %vm949_vm7, %v928_v2 }
 0x2de   : > { %997 = vmatpush.bf16.msra.mxu0 %v3389_v51  ;;  %v3031_v3 = vld [vmem:[%s982_s19] sm:$0xff] }
 0x2df   : > { %v974_v8 = vld [vmem:[%s973_s21] sm:$0xf]  ;;  %v975_v9 = vld [vmem:[%s973_s21 + $0x4] sm:$0xf] }
 0x2e0   : > { %976 = vst.msk [vmem:[#allocation3] sm:$0xf] %vm692_vm6, %v974_v8 }
 0x2e1   : > { %977 = vst.msk [vmem:[#allocation3 + $0x4] sm:$0xf] %vm692_vm6, %v975_v9 }
 0x2e2   : > { %998 = vmatpush.bf16.msra.mxu0 %v3394_v52 }
 0x2e6   : > { %999 = vmatpush.bf16.msra.mxu0 %v3402_v53 }
 0x2ea   : > { %1000 = vmatpush.bf16.msra.mxu0 %v3408_v54 }
 0x2ed   : > { %2721 = vmatmul.msk.bf16.vlgmr.msra.gmra.mxu0 %vm791_vm5, %v3031_v3 }
 0x36a   : > { %v1002_v4 = vpop.f32.mrf.mxu0 }
 0x36b   : > { %v1007_v5 = vpack.c.bf16 %v1002_v4, %v1002_v4 }
 0x36d   : > { %1011 = vrot.lane.b32.xlu0 %v1007_v5, %s3201_s12 }
 0x372   : > { %v1004_v6 = vpop.f32.mrf.mxu0 }
 0x373   : > { %v1008_v7 = vpack.c.bf16 %v1004_v6, %v1004_v6 }
 0x375   : > { %1013 = vrot.lane.b32.xlu0 %v1008_v7, %s3201_s12 }
 0x3df   : > { %v1012_v10 = vpop.permute.xlu0 %1011 }
 0x3e0   : > { %1017 = vst.msk [vmem:[#allocation3] sm:$0xf] %vm949_vm7, %v1012_v10 }
 0x3e7   : > { %v1014_v11 = vpop.permute.xlu0 %1013 }
 0x3e8   : > { %1018 = vst.msk [vmem:[#allocation3 + $0x4] sm:$0xf] %vm949_vm7, %v1014_v11 }
 0x3e9 PF: > { %p2722_p9 = scmp.ge.s32.totalorder %s3181_s27, 1 }
 0x3ea   : > { %s3034_s18 = sadd.s32 (!%p2722_p9), 128, %s3021_s15  ;;  %s3202_s27 = smov (!%p2722_p9), 16  }
 0x3eb   : > { %1022 = sbr.rel (%p2722_p9) target bundleno = 1275 (0x4fb), region = 64  ;;  %s1032_s22 = sshra.s32 (!%p2722_p9), %s3034_s18, 3 }
 0x3ec   : > { %s2728_s23 = sshll.u32 (!%p2722_p9), %s1032_s22, 2 }
 0x3ed   : > { %s1035_s13 = scalar_lea.vmem (!%p2722_p9), %s4081_s5, %s2728_s23 }
 0x3f0   : > { %1050 = vmatpush.bf16.msra.mxu0 %v3389_v51  ;;  %v3035_v12 = vld [vmem:[%s1035_s13] sm:$0xff] }
 0x3f4   : > { %1051 = vmatpush.bf16.msra.mxu0 %v3394_v52  ;;  %v2725_v52 = vld [vmem:[%s3435_s25 + $0x40] sm:$0xf] }
 0x3f5   : > { %1029 = vst.msk [vmem:[#allocation3 + $0x48] sm:$0xf] %vm692_vm6, %v2725_v52 }
 0x3f8   : > { %1052 = vmatpush.bf16.msra.mxu0 %v3402_v53  ;;  %v2726_v53 = vld [vmem:[%s3435_s25 + $0x44] sm:$0xf] }
 0x3f9   : > { %1030 = vst.msk [vmem:[#allocation3 + $0x4c] sm:$0xf] %vm692_vm6, %v2726_v53 }
 0x3fc   : > { %1053 = vmatpush.bf16.msra.mxu0 %v3408_v54 }
 0x3ff   : > { %2733 = vmatmul.msk.bf16.vlgmr.msra.gmra.mxu0 %vm791_vm5, %v3035_v12 }
 0x47c   : > { %v1055_v51 = vpop.f32.mrf.mxu0 }
 0x47d   : > { %v1060_v13 = vpack.c.bf16 %v1055_v51, %v1055_v51 }
 0x47f   : > { %1064 = vrot.lane.b32.xlu0 %v1060_v13, %s3202_s27 }
 0x484   : > { %v1057_v14 = vpop.f32.mrf.mxu0 }
 0x485   : > { %v1061_v15 = vpack.c.bf16 %v1057_v14, %v1057_v14 }
 0x487   : > { %1066 = vrot.lane.b32.xlu0 %v1061_v15, %s3202_s27 }
 0x4f1   : > { %v1065_v16 = vpop.permute.xlu0 %1064 }
 0x4f2   : > { %1070 = vst.msk [vmem:[#allocation3 + $0x48] sm:$0xf] %vm949_vm7, %v1065_v16 }
 0x4f9   : > { %v1067_v17 = vpop.permute.xlu0 %1066 }
 0x4fa   : > { %1071 = vst.msk [vmem:[#allocation3 + $0x4c] sm:$0xf] %vm949_vm7, %v1067_v17 }
 0x4fb PF: > { %v2780_v54 = vld [vmem:[%s4082_s6 + $0x18] sm:$0xf]  ;;  %v3048_v18 = vld [vmem:[%s4082_s6 + $0x20] sm:$0xf0]  ;;  %v2768_v19 = vld [vmem:[%s4082_s6] sm:$0xf] }
 0x4fc   : > { %v2781_v20 = vor.u32 %v3048_v18, %v2780_v54  ;;  %v3045_v21 = vld [vmem:[%s4082_s6 + $0x8] sm:$0xf0]  ;;  %v2788_v22 = vld [vmem:[%s4082_s6 + $0x20] sm:$0xf]  ;;  %v2868_v25 = vld [vmem:[%s4082_s6 + $0x48] sm:$0xf] }
 0x4fd   : > { %v2769_v23 = vor.u32 %v3045_v21, %v2768_v19  ;;  %v3049_v24 = vld [vmem:[%s4082_s6 + $0x28] sm:$0xf0]  ;;  %v3062_v26 = vld [vmem:[%s4082_s6 + $0x50] sm:$0xf0]  ;;  %v3551_v27 = vld [vmem:[#allocation3] sm:$0xff]  ;;  %vm1168_vm8 = vcmask 261120  }
 0x4fe   : > { %1199 = vmatpush.bf16.msra.mxu0 %v2781_v20  ;;  %3107 = vmatpush.bf16.msra.mxu1 %v2781_v20  ;;  %v3553_v28 = vld [vmem:[#allocation3 + $0x10] sm:$0xff]  ;;  %v3047_v29 = vld [vmem:[%s4082_s6 + $0x1c] sm:$0xf]  ;;  %v2789_v30 = vor.u32 %v3049_v24, %v2788_v22  ;;  %v2869_v31 = vor.u32 %v3062_v26, %v2868_v25  ;;  %v2782_v32 = vld [vmem:[%s4082_s6 + $0x24] sm:$0xf0]  ;;  %vm1420_vm9 = vcmask 1046528  }
 0x4ff   : > { %3108 = vmatpush.bf16.msra.mxu2 %v2781_v20  ;;  %3109 = vmatpush.bf16.msra.mxu3 %v2781_v20  ;;  %v3061_v33 = vld [vmem:[%s4082_s6 + $0x4c] sm:$0xf]  ;;  %v2870_v34 = vld [vmem:[%s4082_s6 + $0x54] sm:$0xf0]  ;;  %v3567_v35 = vld [vmem:[#allocation3 + $0x20] sm:$0xff]  ;;  %v2785_v41 = vor.u32 %v3047_v29, %v2782_v32 }
 0x500   : > { %v3569_v36 = vld [vmem:[#allocation3 + $0x30] sm:$0xff]  ;;  %v2776_v37 = vld [vmem:[%s4082_s6 + $0x8] sm:$0xf]  ;;  %v3046_v38 = vld [vmem:[%s4082_s6 + $0x10] sm:$0xf0]  ;;  %v2873_v42 = vor.u32 %v3061_v33, %v2870_v34 }
 0x501   : > { %v2856_v39 = vld [vmem:[%s4082_s6 + $0x30] sm:$0xf]  ;;  %v3059_v40 = vld [vmem:[%s4082_s6 + $0x38] sm:$0xf0]  ;;  %v3044_v43 = vld [vmem:[%s4082_s6 + $0x4] sm:$0xf]  ;;  %v2777_v45 = vor.u32 %v3046_v38, %v2776_v37 }
 0x502   : > { %1200 = vmatpush.bf16.msra.mxu0 %v2769_v23  ;;  %3110 = vmatpush.bf16.msra.mxu1 %v2769_v23  ;;  %v2770_v44 = vld [vmem:[%s4082_s6 + $0xc] sm:$0xf0]  ;;  %v2857_v46 = vor.u32 %v3059_v40, %v2856_v39  ;;  %v3058_v47 = vld [vmem:[%s4082_s6 + $0x34] sm:$0xf]  ;;  %v2858_v48 = vld [vmem:[%s4082_s6 + $0x3c] sm:$0xf0] }
 0x503   : > { %3111 = vmatpush.bf16.msra.mxu2 %v2769_v23  ;;  %3112 = vmatpush.bf16.msra.mxu3 %v2769_v23  ;;  %v2956_v49 = vld [vmem:[%s4082_s6 + $0x78] sm:$0xf]  ;;  %v3076_v50 = vld [vmem:[%s4082_s6 + $0x80] sm:$0xf0]  ;;  %v3075_v55 = vld [vmem:[%s4082_s6 + $0x7c] sm:$0xf]  ;;  %v2773_v56 = vor.u32 %v3044_v43, %v2770_v44  ;;  %v2861_v57 = vor.u32 %v3058_v47, %v2858_v48 }
 0x504   : > { %v2957_v58 = vor.u32 %v3076_v50, %v2956_v49  ;;  %v2958_v59 = vld [vmem:[%s4082_s6 + $0x84] sm:$0xf0]  ;;  %v2876_v60 = vld [vmem:[%s4082_s6 + $0x50] sm:$0xf]  ;;  %v3063_v61 = vld [vmem:[%s4082_s6 + $0x58] sm:$0xf0] }
 0x505   : > { %2790 = vmatmul.msk.bf16.vlgmr.msra.gmra.mxu0 %vm1168_vm8, %v3551_v27  ;;  %2792 = vmatmul.msk.bf16.vlgmr.msra.gmra.mxu1 %vm1168_vm8, %v3553_v28  ;;  %v2961_v62 = vor.u32 %v3075_v55, %v2958_v59  ;;  %v2877_v63 = vor.u32 %v3063_v61, %v2876_v60  ;;  %v2964_v0 = vld [vmem:[%s4082_s6 + $0x80] sm:$0xf]  ;;  %v3077_v1 = vld [vmem:[%s4082_s6 + $0x88] sm:$0xf0]  ;;  %v3037_v3 = vld [vmem:[#allocation3 + $0x8] sm:$0xff] }
 0x506   : > { %2794 = vmatmul.msk.bf16.vlgmr.msra.gmra.mxu2 %vm1168_vm8, %v3567_v35  ;;  %2796 = vmatmul.msk.bf16.vlgmr.msra.gmra.mxu3 %vm1168_vm8, %v3569_v36  ;;  %v2965_v2 = vor.u32 %v3077_v1, %v2964_v0  ;;  %v3039_v4 = vld [vmem:[#allocation3 + $0x18] sm:$0xff]  ;;  %v3041_v5 = vld [vmem:[#allocation3 + $0x28] sm:$0xff]  ;;  %v3644_v8 = vld [vmem:[#allocation3 + $0x10] sm:$0xff] }
 0x507   : > { %1297 = vmatpush.bf16.msrb.mxu2 %v2789_v30  ;;  %1628 = vmatpush.bf16.msrb.mxu3 %v2869_v31  ;;  %v3627_v6 = vld [vmem:[#allocation3 + $0x38] sm:$0xff]  ;;  %v3634_v7 = vld [vmem:[#allocation3 + $0x8] sm:$0xff]  ;;  %v2944_v10 = vld [vmem:[%s4082_s6 + $0x60] sm:$0xf] }
 0x508   : > { %1248 = vmatpush.bf16.msrb.mxu1 %v2785_v41  ;;  %1677 = vmatpush.bf16.msrb.mxu0 %v2873_v42  ;;  %v3652_v9 = vld [vmem:[#allocation3 + $0x18] sm:$0xff]  ;;  %v3073_v11 = vld [vmem:[%s4082_s6 + $0x68] sm:$0xf0]  ;;  %v3072_v12 = vld [vmem:[%s4082_s6 + $0x64] sm:$0xf] }
 0x509   : > { %v2945_v51 = vor.u32 %v3073_v11, %v2944_v10  ;;  %v2946_v13 = vld [vmem:[%s4082_s6 + $0x6c] sm:$0xf0]  ;;  %v2864_v14 = vld [vmem:[%s4082_s6 + $0x38] sm:$0xf]  ;;  %v3060_v15 = vld [vmem:[%s4082_s6 + $0x40] sm:$0xf0] }
 0x50a   : > { %v2949_v52 = vor.u32 %v3072_v12, %v2946_v13  ;;  %v2865_v53 = vor.u32 %v3060_v15, %v2864_v14  ;;  %v2952_v16 = vld [vmem:[%s4082_s6 + $0x68] sm:$0xf]  ;;  %v3074_v17 = vld [vmem:[%s4082_s6 + $0x70] sm:$0xf0]  ;;  %v3686_v18 = vld [vmem:[#allocation3 + $0x20] sm:$0xff] }
 0x50b   : > { %1298 = vmatpush.bf16.msrb.mxu2 %v2777_v45  ;;  %1629 = vmatpush.bf16.msrb.mxu3 %v2857_v46  ;;  %v2953_v54 = vor.u32 %v3074_v17, %v2952_v16  ;;  %v3694_v19 = vld [vmem:[#allocation3 + $0x28] sm:$0xff]  ;;  %v3704_v20 = vld [vmem:[#allocation3 + $0x30] sm:$0xff]  ;;  %v3712_v21 = vld [vmem:[#allocation3 + $0x38] sm:$0xff] }
 0x50c   : > { %1249 = vmatpush.bf16.msrb.mxu1 %v2773_v56  ;;  %1678 = vmatpush.bf16.msrb.mxu0 %v2861_v57 }
 0x50f   : > { %2073 = vmatpush.bf16.msra.mxu2 %v2957_v58  ;;  %2122 = vmatpush.bf16.msra.mxu3 %v2961_v62  ;;  %v3064_v62 = vld [vmem:[#allocation3 + $0x10] sm:$0xff] }
 0x510   : > { %1726 = vmatpush.bf16.msra.mxu1 %v2877_v63  ;;  %2171 = vmatpush.bf16.msra.mxu0 %v2965_v2 }
 0x513   : > { %2074 = vmatpush.bf16.msra.mxu2 %v2945_v51  ;;  %2123 = vmatpush.bf16.msra.mxu3 %v2949_v52 }
 0x514   : > { %1727 = vmatpush.bf16.msra.mxu1 %v2865_v53  ;;  %2172 = vmatpush.bf16.msra.mxu0 %v2953_v54 }
 0x515   : > { %2791 = vmatmul.msk.bf16.gmra.mxu0 %vm1168_vm8, %v3037_v3  ;;  %2793 = vmatmul.msk.bf16.gmra.mxu1 %vm1168_vm8, %v3039_v4 }
 0x516   : > { %2795 = vmatmul.msk.bf16.gmra.mxu2 %vm1168_vm8, %v3041_v5  ;;  %2797 = vmatmul.msk.bf16.gmra.mxu3 %vm1168_vm8, %v3627_v6 }
 0x525   : > { %2798 = vmatmul.msk.bf16.vlgmr.msrb.gmra.mxu1 %vm1168_vm8, %v3551_v27  ;;  %2886 = vmatmul.msk.bf16.vlgmr.msrb.gmra.mxu0 %vm1168_vm8, %v3634_v7 }
 0x526   : > { %2806 = vmatmul.msk.bf16.vlgmr.msrb.gmra.mxu2 %vm1168_vm8, %v3551_v27  ;;  %2878 = vmatmul.msk.bf16.vlgmr.msrb.gmra.mxu3 %vm1168_vm8, %v3634_v7 }
 0x535   : > { %2799 = vmatmul.msk.bf16.gmra.mxu1 %vm1168_vm8, %v3037_v3  ;;  %2887 = vmatmul.msk.bf16.gmra.mxu0 %vm1168_vm8, %v3644_v8 }
 0x536   : > { %2807 = vmatmul.msk.bf16.gmra.mxu2 %vm1168_vm8, %v3037_v3  ;;  %2879 = vmatmul.msk.bf16.gmra.mxu3 %vm1168_vm8, %v3644_v8 }
 0x545   : > { %2800 = vmatmul.msk.bf16.gmra.mxu1 %vm1168_vm8, %v3553_v28  ;;  %2888 = vmatmul.msk.bf16.gmra.mxu0 %vm1168_vm8, %v3652_v9 }
 0x546   : > { %2808 = vmatmul.msk.bf16.gmra.mxu2 %vm1168_vm8, %v3553_v28  ;;  %2880 = vmatmul.msk.bf16.gmra.mxu3 %vm1168_vm8, %v3652_v9 }
 0x555   : > { %2801 = vmatmul.msk.bf16.gmra.mxu1 %vm1168_vm8, %v3039_v4  ;;  %2889 = vmatmul.msk.bf16.gmra.mxu0 %vm1168_vm8, %v3686_v18 }
 0x556   : > { %2809 = vmatmul.msk.bf16.gmra.mxu2 %vm1168_vm8, %v3039_v4  ;;  %2881 = vmatmul.msk.bf16.gmra.mxu3 %vm1168_vm8, %v3686_v18 }
 0x565   : > { %2802 = vmatmul.msk.bf16.gmra.mxu1 %vm1168_vm8, %v3567_v35  ;;  %2890 = vmatmul.msk.bf16.gmra.mxu0 %vm1168_vm8, %v3694_v19 }
 0x566   : > { %2810 = vmatmul.msk.bf16.gmra.mxu2 %vm1168_vm8, %v3567_v35  ;;  %2882 = vmatmul.msk.bf16.gmra.mxu3 %vm1168_vm8, %v3694_v19 }
 0x575   : > { %2803 = vmatmul.msk.bf16.gmra.mxu1 %vm1168_vm8, %v3041_v5  ;;  %2891 = vmatmul.msk.bf16.gmra.mxu0 %vm1168_vm8, %v3704_v20 }
 0x576   : > { %2811 = vmatmul.msk.bf16.gmra.mxu2 %vm1168_vm8, %v3041_v5  ;;  %2883 = vmatmul.msk.bf16.gmra.mxu3 %vm1168_vm8, %v3704_v20 }
 0x582   : > { %v1202_v22 = vpop.f32.mrf.mxu0  ;;  %v3714_v23 = vpop.f32.mrf.mxu1 }
 0x583   : > { %v1356_v24 = vrot.slane %v1202_v22, 7  ;;  %v1362_v29 = vrot.slane %v3714_v23, 7 }
 0x585   : > { %2804 = vmatmul.msk.bf16.gmra.mxu1 %vm1168_vm8, %v3569_v36  ;;  %2892 = vmatmul.msk.bf16.gmra.mxu0 %vm1168_vm8, %v3712_v21  ;;  %v1396_v61 = vsel %vm816_vm4, 0.0, %v1356_v24 }
 0x586   : > { %2812 = vmatmul.msk.bf16.gmra.mxu2 %vm1168_vm8, %v3569_v36  ;;  %2884 = vmatmul.msk.bf16.gmra.mxu3 %vm1168_vm8, %v3712_v21  ;;  %v3735_v36 = vld [vmem:[#allocation3 + $0x40] sm:$0xff] }
 0x589   : > { %v3724_v25 = vpop.f32.mrf.mxu2  ;;  %v3726_v26 = vpop.f32.mrf.mxu3 }
 0x58a   : > { %v1204_v27 = vpop.f32.mrf.mxu0  ;;  %v1214_v28 = vpop.f32.mrf.mxu1  ;;  %v1368_v37 = vrot.slane %v3724_v25, 7  ;;  %v1374_v38 = vrot.slane %v3726_v26, 7 }
 0x58b   : > { %v1357_v30 = vrot.slane %v1204_v27, 7  ;;  %v1363_v31 = vrot.slane %v1214_v28, 7 }
 0x58d   : > { %v1358_v32 = vsel %vm816_vm4, %v1356_v24, %v1357_v30  ;;  %v3733_v33 = vsel %vm816_vm4, %v1362_v29, %v1363_v31 }
 0x591   : > { %v1224_v34 = vpop.f32.mrf.mxu2  ;;  %v1234_v35 = vpop.f32.mrf.mxu3 }
 0x592   : > { %v1369_v39 = vrot.slane %v1224_v34, 7  ;;  %v1375_v40 = vrot.slane %v1234_v35, 7  ;;  %v1207_v41 = vpop.f32.mrf.mxu0  ;;  %v3739_v42 = vpop.f32.mrf.mxu1 }
 0x593   : > { %v1359_v45 = vrot.slane %v1207_v41, 7  ;;  %v1365_v50 = vrot.slane %v3739_v42, 7 }
 0x594   : > { %v3744_v43 = vsel %vm816_vm4, %v1368_v37, %v1369_v39  ;;  %v3749_v44 = vsel %vm816_vm4, %v1374_v38, %v1375_v40 }
 0x595   : > { %2805 = vmatmul.msk.bf16.gmra.mxu1 %vm1168_vm8, %v3627_v6  ;;  %2893 = vmatmul.msk.bf16.gmra.mxu0 %vm1168_vm8, %v3735_v36  ;;  %v1397_v28 = vsel %vm816_vm4, 0.0, %v1359_v45 }
 0x596   : > { %2813 = vmatmul.msk.bf16.gmra.mxu2 %vm1168_vm8, %v3627_v6  ;;  %2885 = vmatmul.msk.bf16.gmra.mxu3 %vm1168_vm8, %v3735_v36 }
 0x599   : > { %v3759_v46 = vpop.f32.mrf.mxu2  ;;  %v3761_v47 = vpop.f32.mrf.mxu3 }
 0x59a   : > { %v1209_v48 = vpop.f32.mrf.mxu0  ;;  %v1219_v49 = vpop.f32.mrf.mxu1  ;;  %v1371_v63 = vrot.slane %v3759_v46, 7  ;;  %v1377_v0 = vrot.slane %v3761_v47, 7 }
 0x59b   : > { %v1360_v55 = vrot.slane %v1209_v48, 7  ;;  %v1366_v56 = vrot.slane %v1219_v49, 7 }
 0x59d   : > { %v1361_v57 = vsel %vm816_vm4, %v1359_v45, %v1360_v55  ;;  %v3768_v58 = vsel %vm816_vm4, %v1365_v50, %v1366_v56 }
 0x5a1   : > { %v1229_v59 = vpop.f32.mrf.mxu2  ;;  %v1239_v60 = vpop.f32.mrf.mxu3 }
 0x5a2   : > { %v1372_v1 = vrot.slane %v1229_v59, 7  ;;  %v1378_v2 = vrot.slane %v1239_v60, 7  ;;  %v1251_v3 = vpop.f32.mrf.mxu1  ;;  %v1680_v4 = vpop.f32.mrf.mxu0 }
 0x5a3   : > { %v1469_v5 = vadd.f32 %v1396_v61, %v1251_v3 }
 0x5a4   : > { %v3776_v6 = vsel %vm816_vm4, %v1371_v63, %v1372_v1  ;;  %v3781_v10 = vsel %vm816_vm4, %v1377_v0, %v1378_v2  ;;  %v3066_v2 = vld [vmem:[#allocation3 + $0x20] sm:$0xff] }
 0x5a5   : > { %2894 = vmatmul.msk.bf16.vlgmr.msra.gmra.mxu1 %vm1168_vm8, %v3634_v7  ;;  %2982 = vmatmul.msk.bf16.vlgmr.msra.gmra.mxu0 %vm1168_vm8, %v3064_v62  ;;  %v3065_v7 = vld [vmem:[#allocation3 + $0x18] sm:$0xff] }
 0x5a6   : > { %2966 = vmatmul.msk.bf16.vlgmr.msra.gmra.mxu2 %vm1168_vm8, %v3064_v62  ;;  %2974 = vmatmul.msk.bf16.vlgmr.msra.gmra.mxu3 %vm1168_vm8, %v3064_v62 }
 0x5a9   : > { %v1300_v11 = vpop.f32.mrf.mxu2  ;;  %v1631_v12 = vpop.f32.mrf.mxu3 }
 0x5aa   : > { %v1785_v51 = vrot.slane %v1631_v12, 7  ;;  %v1253_v13 = vpop.f32.mrf.mxu1  ;;  %v1682_v14 = vpop.f32.mrf.mxu0  ;;  %v1421_v54 = vrot.slane %v1300_v11, 1  ;;  %v1398_v11 = vsel %vm816_vm4, 0.0, %v1362_v29 }
 0x5ab   : > { %v1470_v15 = vadd.f32 %v1358_v32, %v1253_v13 }
 0x5ac   : > { %v1825_v52 = vsel %vm816_vm4, 0.0, %v1785_v51 }
 0x5ad   : > { %v3789_v53 = vadd.f32 %v1825_v52, %v1680_v4 }
 0x5b1   : > { %v1302_v16 = vpop.f32.mrf.mxu2  ;;  %v1633_v17 = vpop.f32.mrf.mxu3 }
 0x5b2   : > { %v1422_v22 = vrot.slane %v1302_v16, 1  ;;  %v1786_v24 = vrot.slane %v1633_v17, 7  ;;  %v1256_v27 = vpop.f32.mrf.mxu1  ;;  %v1685_v30 = vpop.f32.mrf.mxu0 }
 0x5b3   : > { %v1471_v31 = vadd.f32 %v1397_v28, %v1256_v27 }
 0x5b4   : > { %v1423_v34 = vsel %vm1420_vm9, %v1421_v54, %v1422_v22  ;;  %v1461_v32 = vsel %vm1420_vm9, %v1422_v22, 0.0  ;;  %v1787_v35 = vsel %vm816_vm4, %v1785_v51, %v1786_v24 }
 0x5b5   : > { %v3795_v39 = vadd.f32 %v1469_v5, %v1423_v34  ;;  %v3797_v40 = vadd.f32 %v1470_v15, %v1461_v32  ;;  %v3799_v41 = vadd.f32 %v1787_v35, %v1682_v14  ;;  %2895 = vmatmul.msk.bf16.gmra.mxu1 %vm1168_vm8, %v3644_v8  ;;  %2983 = vmatmul.msk.bf16.gmra.mxu0 %vm1168_vm8, %v3065_v7 }
 0x5b6   : > { %2967 = vmatmul.msk.bf16.gmra.mxu2 %vm1168_vm8, %v3065_v7  ;;  %2975 = vmatmul.msk.bf16.gmra.mxu3 %vm1168_vm8, %v3065_v7 }
 0x5b9   : > { %v1305_v45 = vpop.f32.mrf.mxu2  ;;  %v1636_v48 = vpop.f32.mrf.mxu3 }
 0x5ba   : > { %v1788_v49 = vrot.slane %v1636_v48, 7  ;;  %v1258_v55 = vpop.f32.mrf.mxu1  ;;  %v1687_v56 = vpop.f32.mrf.mxu0  ;;  %v1424_v8 = vrot.slane %v1305_v45, 1  ;;  %v1399_v45 = vsel %vm816_vm4, 0.0, %v1365_v50 }
 0x5bb   : > { %v1472_v59 = vadd.f32 %v1361_v57, %v1258_v55 }
 0x5bc   : > { %v1826_v60 = vsel %vm816_vm4, 0.0, %v1788_v49 }
 0x5bd   : > { %v3807_v61 = vadd.f32 %v1826_v60, %v1685_v30 }
 0x5c1   : > { %v1307_v62 = vpop.f32.mrf.mxu2  ;;  %v1638_v1 = vpop.f32.mrf.mxu3 }
 0x5c2   : > { %v1425_v3 = vrot.slane %v1307_v62, 1  ;;  %v1789_v4 = vrot.slane %v1638_v1, 7  ;;  %v1261_v5 = vpop.f32.mrf.mxu1  ;;  %v1690_v12 = vpop.f32.mrf.mxu0 }
 0x5c3   : > { %v1473_v51 = vadd.f32 %v1398_v11, %v1261_v5 }
 0x5c4   : > { %v1426_v13 = vsel %vm1420_vm9, %v1424_v8, %v1425_v3  ;;  %v1462_v57 = vsel %vm1420_vm9, %v1425_v3, 0.0  ;;  %v1790_v14 = vsel %vm816_vm4, %v1788_v49, %v1789_v4 }
 0x5c5   : > { %v3815_v15 = vadd.f32 %v1471_v31, %v1426_v13  ;;  %v3817_v52 = vadd.f32 %v1472_v59, %v1462_v57  ;;  %v3819_v16 = vadd.f32 %v1790_v14, %v1687_v56  ;;  %2896 = vmatmul.msk.bf16.gmra.mxu1 %vm1168_vm8, %v3652_v9  ;;  %2984 = vmatmul.msk.bf16.gmra.mxu0 %vm1168_vm8, %v3066_v2  ;;  %v3067_v9 = vld [vmem:[#allocation3 + $0x28] sm:$0xff] }
 0x5c6   : > { %2968 = vmatmul.msk.bf16.gmra.mxu2 %vm1168_vm8, %v3066_v2  ;;  %2976 = vmatmul.msk.bf16.gmra.mxu3 %vm1168_vm8, %v3066_v2 }
 0x5c9   : > { %v1310_v23 = vpop.f32.mrf.mxu2  ;;  %v1641_v29 = vpop.f32.mrf.mxu3 }
 0x5ca   : > { %v1791_v17 = vrot.slane %v1641_v29, 7  ;;  %v1263_v7 = vpop.f32.mrf.mxu1  ;;  %v1692_v54 = vpop.f32.mrf.mxu0  ;;  %v1427_v31 = vrot.slane %v1310_v23, 1  ;;  %v1400_v23 = vsel %vm816_vm4, 0.0, %v1368_v37 }
 0x5cb   : > { %v1474_v22 = vadd.f32 %v3733_v33, %v1263_v7 }
 0x5cc   : > { %v1827_v24 = vsel %vm816_vm4, 0.0, %v1791_v17 }
 0x5cd   : > { %v3828_v27 = vadd.f32 %v1827_v24, %v1690_v12 }
 0x5d1   : > { %v1312_v28 = vpop.f32.mrf.mxu2  ;;  %v1643_v30 = vpop.f32.mrf.mxu3 }
 0x5d2   : > { %v1428_v34 = vrot.slane %v1312_v28, 1  ;;  %v1792_v32 = vrot.slane %v1643_v30, 7  ;;  %v1266_v35 = vpop.f32.mrf.mxu1  ;;  %v1695_v48 = vpop.f32.mrf.mxu0 }
 0x5d3   : > { %v1475_v49 = vadd.f32 %v1399_v45, %v1266_v35 }
 0x5d4   : > { %v1429_v55 = vsel %vm1420_vm9, %v1427_v31, %v1428_v34  ;;  %v1463_v33 = vsel %vm1420_vm9, %v1428_v34, 0.0  ;;  %v1793_v56 = vsel %vm816_vm4, %v1791_v17, %v1792_v32 }
 0x5d5   : > { %v3836_v59 = vadd.f32 %v1473_v51, %v1429_v55  ;;  %v3838_v60 = vadd.f32 %v1474_v22, %v1463_v33  ;;  %v3840_v62 = vadd.f32 %v1793_v56, %v1692_v54  ;;  %2897 = vmatmul.msk.bf16.gmra.mxu1 %vm1168_vm8, %v3686_v18  ;;  %2985 = vmatmul.msk.bf16.gmra.mxu0 %vm1168_vm8, %v3067_v9  ;;  %v3068_v18 = vld [vmem:[#allocation3 + $0x30] sm:$0xff] }
 0x5d6   : > { %2969 = vmatmul.msk.bf16.gmra.mxu2 %vm1168_vm8, %v3067_v9  ;;  %2977 = vmatmul.msk.bf16.gmra.mxu3 %vm1168_vm8, %v3067_v9 }
 0x5d9   : > { %v1315_v42 = vpop.f32.mrf.mxu2  ;;  %v1646_v50 = vpop.f32.mrf.mxu3 }
 0x5da   : > { %v1794_v1 = vrot.slane %v1646_v50, 7  ;;  %v1268_v2 = vpop.f32.mrf.mxu1  ;;  %v1697_v8 = vpop.f32.mrf.mxu0  ;;  %v1430_v51 = vrot.slane %v1315_v42, 1  ;;  %v1401_v42 = vsel %vm816_vm4, 0.0, %v1371_v63 }
 0x5db   : > { %v1476_v3 = vadd.f32 %v3768_v58, %v1268_v2 }
 0x5dc   : > { %v1828_v4 = vsel %vm816_vm4, 0.0, %v1794_v1 }
 0x5dd   : > { %v3849_v5 = vadd.f32 %v1828_v4, %v1695_v48 }
 0x5e1   : > { %v1317_v11 = vpop.f32.mrf.mxu2  ;;  %v1648_v12 = vpop.f32.mrf.mxu3 }
 0x5e2   : > { %v1431_v13 = vrot.slane %v1317_v11, 1  ;;  %v1795_v57 = vrot.slane %v1648_v12, 7  ;;  %v1271_v14 = vpop.f32.mrf.mxu1  ;;  %v1700_v29 = vpop.f32.mrf.mxu0 }
 0x5e3   : > { %v1477_v17 = vadd.f32 %v1400_v23, %v1271_v14 }
 0x5e4   : > { %v1432_v7 = vsel %vm1420_vm9, %v1430_v51, %v1431_v13  ;;  %v1464_v58 = vsel %vm1420_vm9, %v1431_v13, 0.0  ;;  %v1796_v54 = vsel %vm816_vm4, %v1794_v1, %v1795_v57 }
 0x5e5   : > { %v3857_v22 = vadd.f32 %v1475_v49, %v1432_v7  ;;  %v3859_v24 = vadd.f32 %v1476_v3, %v1464_v58  ;;  %v3861_v28 = vadd.f32 %v1796_v54, %v1697_v8  ;;  %2898 = vmatmul.msk.bf16.gmra.mxu1 %vm1168_vm8, %v3694_v19  ;;  %2986 = vmatmul.msk.bf16.gmra.mxu0 %vm1168_vm8, %v3068_v18  ;;  %v3069_v19 = vld [vmem:[#allocation3 + $0x38] sm:$0xff] }
 0x5e6   : > { %2970 = vmatmul.msk.bf16.gmra.mxu2 %vm1168_vm8, %v3068_v18  ;;  %2978 = vmatmul.msk.bf16.gmra.mxu3 %vm1168_vm8, %v3068_v18 }
 0x5e9   : > { %v1320_v25 = vpop.f32.mrf.mxu2  ;;  %v1651_v37 = vpop.f32.mrf.mxu3 }
 0x5ea   : > { %v1797_v30 = vrot.slane %v1651_v37, 7  ;;  %v1273_v9 = vpop.f32.mrf.mxu1  ;;  %v1702_v31 = vpop.f32.mrf.mxu0  ;;  %v1433_v49 = vrot.slane %v1320_v25, 1  ;;  %v1402_v25 = vsel %vm816_vm4, 0.0, %v1374_v38 }
 0x5eb   : > { %v1478_v34 = vadd.f32 %v3744_v43, %v1273_v9 }
 0x5ec   : > { %v1829_v32 = vsel %vm816_vm4, 0.0, %v1797_v30 }
 0x5ed   : > { %v3870_v35 = vadd.f32 %v1829_v32, %v1700_v29 }
 0x5f1   : > { %v1322_v45 = vpop.f32.mrf.mxu2  ;;  %v1653_v48 = vpop.f32.mrf.mxu3 }
 0x5f2   : > { %v1434_v55 = vrot.slane %v1322_v45, 1  ;;  %v1798_v33 = vrot.slane %v1653_v48, 7  ;;  %v1276_v56 = vpop.f32.mrf.mxu1  ;;  %v1705_v50 = vpop.f32.mrf.mxu0 }
 0x5f3   : > { %v1479_v1 = vadd.f32 %v1401_v42, %v1276_v56 }
 0x5f4   : > { %v1435_v2 = vsel %vm1420_vm9, %v1433_v49, %v1434_v55  ;;  %v1465_v43 = vsel %vm1420_vm9, %v1434_v55, 0.0  ;;  %v1799_v8 = vsel %vm816_vm4, %v1797_v30, %v1798_v33 }
 0x5f5   : > { %v3878_v3 = vadd.f32 %v1477_v17, %v1435_v2  ;;  %v3880_v4 = vadd.f32 %v1478_v34, %v1465_v43  ;;  %v3882_v11 = vadd.f32 %v1799_v8, %v1702_v31  ;;  %2899 = vmatmul.msk.bf16.gmra.mxu1 %vm1168_vm8, %v3704_v20  ;;  %2987 = vmatmul.msk.bf16.gmra.mxu0 %vm1168_vm8, %v3069_v19  ;;  %v3070_v20 = vld [vmem:[#allocation3 + $0x40] sm:$0xff] }
 0x5f6   : > { %2971 = vmatmul.msk.bf16.gmra.mxu2 %vm1168_vm8, %v3069_v19  ;;  %2979 = vmatmul.msk.bf16.gmra.mxu3 %vm1168_vm8, %v3069_v19 }
 0x5f9   : > { %v1325_v46 = vpop.f32.mrf.mxu2  ;;  %v1656_v63 = vpop.f32.mrf.mxu3 }
 0x5fa   : > { %v1800_v12 = vrot.slane %v1656_v63, 7  ;;  %v1278_v18 = vpop.f32.mrf.mxu1  ;;  %v1707_v51 = vpop.f32.mrf.mxu0  ;;  %v1436_v17 = vrot.slane %v1325_v46, 1  ;;  %v1403_v46 = vsel %vm816_vm4, 0.0, %v1377_v0 }
 0x5fb   : > { %v1480_v13 = vadd.f32 %v3776_v6, %v1278_v18 }
 0x5fc   : > { %v1830_v57 = vsel %vm816_vm4, 0.0, %v1800_v12 }
 0x5fd   : > { %v3891_v14 = vadd.f32 %v1830_v57, %v1705_v50 }
 0x601   : > { %v1327_v23 = vpop.f32.mrf.mxu2  ;;  %v1658_v29 = vpop.f32.mrf.mxu3 }
 0x602   : > { %v1437_v7 = vrot.slane %v1327_v23, 1  ;;  %v1801_v58 = vrot.slane %v1658_v29, 7  ;;  %v1281_v54 = vpop.f32.mrf.mxu1  ;;  %v1710_v37 = vpop.f32.mrf.mxu0 }
 0x603   : > { %v1481_v30 = vadd.f32 %v1402_v25, %v1281_v54 }
 0x604   : > { %v1438_v9 = vsel %vm1420_vm9, %v1436_v17, %v1437_v7  ;;  %v1466_v6 = vsel %vm1420_vm9, %v1437_v7, 0.0  ;;  %v1802_v31 = vsel %vm816_vm4, %v1800_v12, %v1801_v58 }
 0x605   : > { %v3899_v34 = vadd.f32 %v1479_v1, %v1438_v9  ;;  %v3901_v32 = vadd.f32 %v1480_v13, %v1466_v6  ;;  %v3903_v45 = vadd.f32 %v1802_v31, %v1707_v51  ;;  %2900 = vmatmul.msk.bf16.gmra.mxu1 %vm1168_vm8, %v3712_v21  ;;  %2988 = vmatmul.msk.bf16.gmra.mxu0 %vm1168_vm8, %v3070_v20  ;;  %v3071_v21 = vld [vmem:[#allocation3 + $0x48] sm:$0xff] }
 0x606   : > { %2972 = vmatmul.msk.bf16.gmra.mxu2 %vm1168_vm8, %v3070_v20  ;;  %2980 = vmatmul.msk.bf16.gmra.mxu3 %vm1168_vm8, %v3070_v20 }
 0x609   : > { %v1330_v26 = vpop.f32.mrf.mxu2  ;;  %v1661_v38 = vpop.f32.mrf.mxu3 }
 0x60a   : > { %v1803_v48 = vrot.slane %v1661_v38, 7  ;;  %v1283_v19 = vpop.f32.mrf.mxu1  ;;  %v1712_v49 = vpop.f32.mrf.mxu0  ;;  %v1439_v1 = vrot.slane %v1330_v26, 1 }
 0x60b   : > { %v1482_v55 = vadd.f32 %v3749_v44, %v1283_v19 }
 0x60c   : > { %v1831_v33 = vsel %vm816_vm4, 0.0, %v1803_v48 }
 0x60d   : > { %v3912_v56 = vadd.f32 %v1831_v33, %v1710_v37 }
 0x611   : > { %v1332_v42 = vpop.f32.mrf.mxu2  ;;  %v1663_v50 = vpop.f32.mrf.mxu3 }
 0x612   : > { %v1440_v2 = vrot.slane %v1332_v42, 1  ;;  %v1804_v43 = vrot.slane %v1663_v50, 7  ;;  %v1286_v8 = vpop.f32.mrf.mxu1  ;;  %v1715_v63 = vpop.f32.mrf.mxu0 }
 0x613   : > { %v1483_v12 = vadd.f32 %v1403_v46, %v1286_v8 }
 0x614   : > { %v1441_v18 = vsel %vm1420_vm9, %v1439_v1, %v1440_v2  ;;  %v1467_v44 = vsel %vm1420_vm9, %v1440_v2, 0.0  ;;  %v1805_v51 = vsel %vm816_vm4, %v1803_v48, %v1804_v43 }
 0x615   : > { %v3920_v13 = vadd.f32 %v1481_v30, %v1441_v18  ;;  %v3922_v57 = vadd.f32 %v1482_v55, %v1467_v44  ;;  %v3924_v23 = vadd.f32 %v1805_v51, %v1712_v49  ;;  %2901 = vmatmul.msk.bf16.gmra.mxu1 %vm1168_vm8, %v3735_v36  ;;  %2989 = vmatmul.msk.bf16.gmra.mxu0 %vm1168_vm8, %v3071_v21 }
 0x616   : > { %2973 = vmatmul.msk.bf16.gmra.mxu2 %vm1168_vm8, %v3071_v21  ;;  %2981 = vmatmul.msk.bf16.gmra.mxu3 %vm1168_vm8, %v3071_v21 }
 0x619   : > { %v1335_v47 = vpop.f32.mrf.mxu2  ;;  %v1666_v0 = vpop.f32.mrf.mxu3 }
 0x61a   : > { %v1806_v29 = vrot.slane %v1666_v0, 7  ;;  %v1288_v20 = vpop.f32.mrf.mxu1  ;;  %v1717_v17 = vpop.f32.mrf.mxu0  ;;  %v1442_v36 = vrot.slane %v1335_v47, 1 }
 0x61b   : > { %v1484_v7 = vadd.f32 %v3781_v10, %v1288_v20 }
 0x61c   : > { %v1832_v58 = vsel %vm816_vm4, 0.0, %v1806_v29 }
 0x61d   : > { %v3933_v54 = vadd.f32 %v1832_v58, %v1715_v63 }
 0x621   : > { %v1337_v25 = vpop.f32.mrf.mxu2  ;;  %v1668_v37 = vpop.f32.mrf.mxu3 }
 0x622   : > { %v1443_v30 = vrot.slane %v1337_v25, 1  ;;  %v1807_v9 = vrot.slane %v1668_v37, 7  ;;  %v1729_v6 = vpop.f32.mrf.mxu1  ;;  %v2174_v31 = vpop.f32.mrf.mxu0 }
 0x623   : > { %v2294_v55 = vrot.slane %v2174_v31, 1  ;;  %v1849_v2 = vrot.slane %v1729_v6, 1 }
 0x624   : > { %v1444_v26 = vsel %vm1420_vm9, %v1442_v36, %v1443_v30  ;;  %v1468_v38 = vsel %vm1420_vm9, %v1443_v30, 0.0  ;;  %v1808_v48 = vsel %vm816_vm4, %v1806_v29, %v1807_v9 }
 0x625   : > { %v3938_v19 = vadd.f32 %v1483_v12, %v1444_v26  ;;  %v3940_v10 = vadd.f32 %v1484_v7, %v1468_v38  ;;  %v3942_v49 = vadd.f32 %v1808_v48, %v1717_v17  ;;  %v3955_v17 = vld [vmem:[%s4083_s7] ss:$0 sm:$0xff] }
 0x629   : > { %v2076_v33 = vpop.f32.mrf.mxu2  ;;  %v2125_v42 = vpop.f32.mrf.mxu3 }
 0x62a   : > { %v2230_v50 = vrot.slane %v2076_v33, 7  ;;  %v1731_v21 = vpop.f32.mrf.mxu1  ;;  %v2176_v1 = vpop.f32.mrf.mxu0 }
 0x62b   : > { %v1850_v43 = vrot.slane %v1731_v21, 1  ;;  %v2295_v8 = vrot.slane %v2176_v1, 1 }
 0x62c   : > { %v2270_v46 = vsel %vm816_vm4, 0.0, %v2230_v50 }
 0x62d   : > { %v2342_v63 = vadd.f32 %v2270_v46, %v2125_v42  ;;  %v1851_v18 = vsel %vm1420_vm9, %v1849_v2, %v1850_v43  ;;  %v1889_v12 = vsel %vm1420_vm9, %v1850_v43, 0.0  ;;  %v2296_v44 = vsel %vm1420_vm9, %v2294_v55, %v2295_v8 }
 0x62e   : > { %v1913_v51 = vadd.f32 %v3789_v53, %v1851_v18  ;;  %v1914_v47 = vadd.f32 %v3799_v41, %v1889_v12  ;;  %v2334_v9 = vsel %vm1420_vm9, %v2295_v8, 0.0 }
 0x62f   : > { %v2358_v20 = vadd.f32 %v2342_v63, %v2296_v44 }
 0x630   : > { %v1929_v0 = vadd.f32 %v1913_v51, %v3795_v39  ;;  %v1930_v29 = vadd.f32 %v1914_v47, %v3797_v40 }
 0x631   : > { %v2078_v7 = vpop.f32.mrf.mxu2  ;;  %v2127_v58 = vpop.f32.mrf.mxu3 }
 0x632   : > { %v2374_v25 = vadd.f32 %v2358_v20, %v1929_v0  ;;  %v2231_v37 = vrot.slane %v2078_v7, 7  ;;  %v1734_v36 = vpop.f32.mrf.mxu1  ;;  %v2179_v30 = vpop.f32.mrf.mxu0 }
 0x633   : > { %v2297_v48 = vrot.slane %v2179_v30, 1  ;;  %v1852_v1 = vrot.slane %v1734_v36, 1 }
 0x634   : > { %v2394_v53 = vadd.f32 %v3955_v17, %v2374_v25  ;;  %v2232_v41 = vsel %vm816_vm4, %v2230_v50, %v2231_v37 }
 0x635   : > { %v2343_v39 = vadd.f32 %v2232_v41, %v2127_v58 }
 0x636   : > { %v2410_v40 = vmax.f32 %v2394_v53, 0.0 }
 0x637   : > { %v2359_v6 = vadd.f32 %v2343_v39, %v2334_v9 }
 0x638   : > { %2426 = vst [vmem:[%s3293_s24] sm:$0xff] %v2410_v40 }
 0x639   : > { %v2375_v31 = vadd.f32 %v2359_v6, %v1930_v29  ;;  %v2081_v26 = vpop.f32.mrf.mxu2  ;;  %v2130_v38 = vpop.f32.mrf.mxu3 }
 0x63a   : > { %v2233_v55 = vrot.slane %v2081_v26, 7  ;;  %v1736_v33 = vpop.f32.mrf.mxu1  ;;  %v2181_v42 = vpop.f32.mrf.mxu0 }
 0x63b   : > { %v2395_v21 = vadd.f32 %v3955_v17, %v2375_v31  ;;  %v1853_v2 = vrot.slane %v1736_v33, 1  ;;  %v2298_v43 = vrot.slane %v2181_v42, 1 }
 0x63c   : > { %v2271_v50 = vsel %vm816_vm4, 0.0, %v2233_v55 }
 0x63d   : > { %v2411_v46 = vmax.f32 %v2395_v21, 0.0  ;;  %v2344_v8 = vadd.f32 %v2271_v50, %v2130_v38  ;;  %v1854_v63 = vsel %vm1420_vm9, %v1852_v1, %v1853_v2  ;;  %v1890_v18 = vsel %vm1420_vm9, %v1853_v2, 0.0 }
 0x63e   : > { %v1915_v12 = vadd.f32 %v3807_v61, %v1854_v63  ;;  %v1916_v44 = vadd.f32 %v3819_v16, %v1890_v18  ;;  %v2299_v51 = vsel %vm1420_vm9, %v2297_v48, %v2298_v43  ;;  %v2335_v53 = vsel %vm1420_vm9, %v2298_v43, 0.0 }
 0x63f   : > { %2427 = vst [vmem:[%s3293_s24 + $0x8] sm:$0xff] %v2411_v46  ;;  %v2360_v29 = vadd.f32 %v2344_v8, %v2299_v51 }
 0x640   : > { %v1931_v47 = vadd.f32 %v1915_v12, %v3815_v15  ;;  %v1932_v0 = vadd.f32 %v1916_v44, %v3817_v52 }
 0x641   : > { %v2083_v20 = vpop.f32.mrf.mxu2  ;;  %v2132_v7 = vpop.f32.mrf.mxu3 }
 0x642   : > { %v2376_v58 = vadd.f32 %v2360_v29, %v1931_v47  ;;  %v2234_v25 = vrot.slane %v2083_v20, 7  ;;  %v1739_v37 = vpop.f32.mrf.mxu1  ;;  %v2184_v36 = vpop.f32.mrf.mxu0 }
 0x643   : > { %v2300_v40 = vrot.slane %v2184_v36, 1  ;;  %v1855_v48 = vrot.slane %v1739_v37, 1 }
 0x644   : > { %v2396_v30 = vadd.f32 %v3955_v17, %v2376_v58  ;;  %v2235_v61 = vsel %vm816_vm4, %v2233_v55, %v2234_v25 }
 0x645   : > { %v2345_v16 = vadd.f32 %v2235_v61, %v2132_v7 }
 0x646   : > { %v2412_v41 = vmax.f32 %v2396_v30, 0.0 }
 0x647   : > { %v2361_v39 = vadd.f32 %v2345_v16, %v2335_v53 }
 0x648   : > { %2428 = vst [vmem:[%s3293_s24 + $0x10] sm:$0xff] %v2412_v41 }
 0x649   : > { %v2377_v15 = vadd.f32 %v2361_v39, %v1932_v0  ;;  %v2086_v9 = vpop.f32.mrf.mxu2  ;;  %v2135_v52 = vpop.f32.mrf.mxu3 }
 0x64a   : > { %v2236_v6 = vrot.slane %v2086_v9, 7  ;;  %v1741_v31 = vpop.f32.mrf.mxu1  ;;  %v2186_v26 = vpop.f32.mrf.mxu0 }
 0x64b   : > { %v2397_v38 = vadd.f32 %v3955_v17, %v2377_v15  ;;  %v1856_v33 = vrot.slane %v1741_v31, 1  ;;  %v2301_v42 = vrot.slane %v2186_v26, 1 }
 0x64c   : > { %v2272_v55 = vsel %vm816_vm4, 0.0, %v2236_v6 }
 0x64d   : > { %v2413_v21 = vmax.f32 %v2397_v38, 0.0  ;;  %v2346_v1 = vadd.f32 %v2272_v55, %v2135_v52  ;;  %v1857_v2 = vsel %vm1420_vm9, %v1855_v48, %v1856_v33  ;;  %v1891_v43 = vsel %vm1420_vm9, %v1856_v33, 0.0 }
 0x64e   : > { %v1917_v50 = vadd.f32 %v3828_v27, %v1857_v2  ;;  %v1918_v46 = vadd.f32 %v3840_v62, %v1891_v43  ;;  %v2302_v8 = vsel %vm1420_vm9, %v2300_v40, %v2301_v42  ;;  %v2336_v58 = vsel %vm1420_vm9, %v2301_v42, 0.0 }
 0x64f   : > { %2429 = vst [vmem:[%s3293_s24 + $0x18] sm:$0xff] %v2413_v21  ;;  %v2362_v12 = vadd.f32 %v2346_v1, %v2302_v8 }
 0x650   : > { %v1933_v63 = vadd.f32 %v1917_v50, %v3836_v59  ;;  %v1934_v18 = vadd.f32 %v1918_v46, %v3838_v60 }
 0x651   : > { %v2088_v44 = vpop.f32.mrf.mxu2  ;;  %v2137_v51 = vpop.f32.mrf.mxu3 }
 0x652   : > { %v2378_v47 = vadd.f32 %v2362_v12, %v1933_v63  ;;  %v2237_v0 = vrot.slane %v2088_v44, 7  ;;  %v1744_v29 = vpop.f32.mrf.mxu1  ;;  %v2189_v20 = vpop.f32.mrf.mxu0 }
 0x653   : > { %v2303_v30 = vrot.slane %v2189_v20, 1  ;;  %v1858_v39 = vrot.slane %v1744_v29, 1 }
 0x654   : > { %v2398_v7 = vadd.f32 %v3955_v17, %v2378_v47  ;;  %v2238_v27 = vsel %vm816_vm4, %v2236_v6, %v2237_v0 }
 0x655   : > { %v2347_v62 = vadd.f32 %v2238_v27, %v2137_v51 }
 0x656   : > { %v2414_v25 = vmax.f32 %v2398_v7, 0.0 }
 0x657   : > { %v2363_v37 = vadd.f32 %v2347_v62, %v2336_v58 }
 0x658   : > { %2430 = vst [vmem:[%s3293_s24 + $0x20] sm:$0xff] %v2414_v25 }
 0x659   : > { %v2379_v59 = vadd.f32 %v2363_v37, %v1934_v18  ;;  %v2091_v36 = vpop.f32.mrf.mxu2  ;;  %v2140_v60 = vpop.f32.mrf.mxu3 }
 0x65a   : > { %v2239_v61 = vrot.slane %v2091_v36, 7  ;;  %v1746_v16 = vpop.f32.mrf.mxu1  ;;  %v2191_v53 = vpop.f32.mrf.mxu0 }
 0x65b   : > { %v2399_v41 = vadd.f32 %v3955_v17, %v2379_v59  ;;  %v1859_v15 = vrot.slane %v1746_v16, 1  ;;  %v2304_v9 = vrot.slane %v2191_v53, 1 }
 0x65c   : > { %v2273_v52 = vsel %vm816_vm4, 0.0, %v2239_v61 }
 0x65d   : > { %v2415_v40 = vmax.f32 %v2399_v41, 0.0  ;;  %v2348_v6 = vadd.f32 %v2273_v52, %v2140_v60  ;;  %v1860_v31 = vsel %vm1420_vm9, %v1858_v39, %v1859_v15  ;;  %v1892_v26 = vsel %vm1420_vm9, %v1859_v15, 0.0 }
 0x65e   : > { %v1919_v38 = vadd.f32 %v3849_v5, %v1860_v31  ;;  %v1920_v48 = vadd.f32 %v3861_v28, %v1892_v26  ;;  %v2305_v33 = vsel %vm1420_vm9, %v2303_v30, %v2304_v9  ;;  %v2337_v18 = vsel %vm1420_vm9, %v2304_v9, 0.0 }
 0x65f   : > { %2431 = vst [vmem:[%s3293_s24 + $0x28] sm:$0xff] %v2415_v40  ;;  %v2364_v21 = vadd.f32 %v2348_v6, %v2305_v33 }
 0x660   : > { %v1935_v42 = vadd.f32 %v1919_v38, %v3857_v22  ;;  %v1936_v55 = vadd.f32 %v1920_v48, %v3859_v24 }
 0x661   : > { %v2093_v1 = vpop.f32.mrf.mxu2  ;;  %v2142_v2 = vpop.f32.mrf.mxu3 }
 0x662   : > { %v2380_v43 = vadd.f32 %v2364_v21, %v1935_v42  ;;  %v2240_v50 = vrot.slane %v2093_v1, 7  ;;  %v1749_v46 = vpop.f32.mrf.mxu1  ;;  %v2194_v8 = vpop.f32.mrf.mxu0 }
 0x663   : > { %v2306_v47 = vrot.slane %v2194_v8, 1  ;;  %v1861_v27 = vrot.slane %v1749_v46, 1 }
 0x664   : > { %v2400_v63 = vadd.f32 %v3955_v17, %v2380_v43  ;;  %v2241_v5 = vsel %vm816_vm4, %v2239_v61, %v2240_v50 }
 0x665   : > { %v2349_v28 = vadd.f32 %v2241_v5, %v2142_v2 }
 0x666   : > { %v2416_v12 = vmax.f32 %v2400_v63, 0.0 }
 0x667   : > { %v2365_v44 = vadd.f32 %v2349_v28, %v2337_v18 }
 0x668   : > { %2432 = vst [vmem:[%s3293_s24 + $0x30] sm:$0xff] %v2416_v12 }
 0x669   : > { %v2381_v22 = vadd.f32 %v2365_v44, %v1936_v55  ;;  %v2096_v51 = vpop.f32.mrf.mxu2  ;;  %v2145_v24 = vpop.f32.mrf.mxu3 }
 0x66a   : > { %v2242_v0 = vrot.slane %v2096_v51, 7  ;;  %v1751_v29 = vpop.f32.mrf.mxu1  ;;  %v2196_v20 = vpop.f32.mrf.mxu0 }
 0x66b   : > { %v2401_v7 = vadd.f32 %v3955_v17, %v2381_v22  ;;  %v1862_v62 = vrot.slane %v1751_v29, 1  ;;  %v2307_v58 = vrot.slane %v2196_v20, 1 }
 0x66c   : > { %v2274_v25 = vsel %vm816_vm4, 0.0, %v2242_v0 }
 0x66d   : > { %v2417_v37 = vmax.f32 %v2401_v7, 0.0  ;;  %v2350_v59 = vadd.f32 %v2274_v25, %v2145_v24  ;;  %v1863_v36 = vsel %vm1420_vm9, %v1861_v27, %v1862_v62  ;;  %v1893_v60 = vsel %vm1420_vm9, %v1862_v62, 0.0 }
 0x66e   : > { %v1921_v30 = vadd.f32 %v3870_v35, %v1863_v36  ;;  %v1922_v61 = vadd.f32 %v3882_v11, %v1893_v60  ;;  %v2308_v16 = vsel %vm1420_vm9, %v2306_v47, %v2307_v58  ;;  %v2338_v38 = vsel %vm1420_vm9, %v2307_v58, 0.0 }
 0x66f   : > { %2433 = vst [vmem:[%s3293_s24 + $0x38] sm:$0xff] %v2417_v37  ;;  %v2366_v39 = vadd.f32 %v2350_v59, %v2308_v16 }
 0x670   : > { %v1937_v53 = vadd.f32 %v1921_v30, %v3878_v3  ;;  %v1938_v41 = vadd.f32 %v1922_v61, %v3880_v4 }
 0x671   : > { %v2098_v15 = vpop.f32.mrf.mxu2  ;;  %v2147_v9 = vpop.f32.mrf.mxu3 }
 0x672   : > { %v2382_v52 = vadd.f32 %v2366_v39, %v1937_v53  ;;  %v2243_v40 = vrot.slane %v2098_v15, 7  ;;  %v1754_v6 = vpop.f32.mrf.mxu1  ;;  %v2199_v31 = vpop.f32.mrf.mxu0 }
 0x673   : > { %v2309_v55 = vrot.slane %v2199_v31, 1  ;;  %v1864_v50 = vrot.slane %v1754_v6, 1 }
 0x674   : > { %v2402_v26 = vadd.f32 %v3955_v17, %v2382_v52  ;;  %v2244_v35 = vsel %vm816_vm4, %v2242_v0, %v2243_v40 }
 0x675   : > { %v2351_v11 = vadd.f32 %v2244_v35, %v2147_v9 }
 0x676   : > { %v2418_v48 = vmax.f32 %v2402_v26, 0.0 }
 0x677   : > { %v2367_v33 = vadd.f32 %v2351_v11, %v2338_v38 }
 0x678   : > { %2434 = vst [vmem:[%s3293_s24 + $0x40] sm:$0xff] %v2418_v48 }
 0x679   : > { %v2383_v3 = vadd.f32 %v2367_v33, %v1938_v41  ;;  %v2101_v42 = vpop.f32.mrf.mxu2  ;;  %v2150_v4 = vpop.f32.mrf.mxu3 }
 0x67a   : > { %v2245_v21 = vrot.slane %v2101_v42, 7  ;;  %v1756_v1 = vpop.f32.mrf.mxu1  ;;  %v2201_v2 = vpop.f32.mrf.mxu0 }
 0x67b   : > { %v2403_v43 = vadd.f32 %v3955_v17, %v2383_v3  ;;  %v1865_v46 = vrot.slane %v1756_v1, 1  ;;  %v2310_v8 = vrot.slane %v2201_v2, 1 }
 0x67c   : > { %v2275_v63 = vsel %vm816_vm4, 0.0, %v2245_v21 }
 0x67d   : > { %v2419_v5 = vmax.f32 %v2403_v43, 0.0  ;;  %v2352_v28 = vadd.f32 %v2275_v63, %v2150_v4  ;;  %v1866_v18 = vsel %vm1420_vm9, %v1864_v50, %v1865_v46  ;;  %v1894_v12 = vsel %vm1420_vm9, %v1865_v46, 0.0 }
 0x67e   : > { %v1923_v44 = vadd.f32 %v3891_v14, %v1866_v18  ;;  %v1924_v22 = vadd.f32 %v3903_v45, %v1894_v12  ;;  %v2311_v51 = vsel %vm1420_vm9, %v2309_v55, %v2310_v8  ;;  %v2339_v37 = vsel %vm1420_vm9, %v2310_v8, 0.0 }
 0x67f   : > { %2435 = vst [vmem:[%s3293_s24 + $0x48] sm:$0xff] %v2419_v5  ;;  %v2368_v0 = vadd.f32 %v2352_v28, %v2311_v51 }
 0x680   : > { %v1939_v24 = vadd.f32 %v1923_v44, %v3899_v34  ;;  %v1940_v47 = vadd.f32 %v1924_v22, %v3901_v32 }
 0x681   : > { %v2103_v29 = vpop.f32.mrf.mxu2  ;;  %v2152_v20 = vpop.f32.mrf.mxu3 }
 0x682   : > { %v2384_v7 = vadd.f32 %v2368_v0, %v1939_v24  ;;  %v2246_v27 = vrot.slane %v2103_v29, 7  ;;  %v1759_v62 = vpop.f32.mrf.mxu1  ;;  %v2204_v58 = vpop.f32.mrf.mxu0 }
 0x683   : > { %v2312_v30 = vrot.slane %v2204_v58, 1  ;;  %v1867_v39 = vrot.slane %v1759_v62, 1 }
 0x684   : > { %v2404_v25 = vadd.f32 %v3955_v17, %v2384_v7  ;;  %v2247_v14 = vsel %vm816_vm4, %v2245_v21, %v2246_v27 }
 0x685   : > { %v2353_v45 = vadd.f32 %v2247_v14, %v2152_v20 }
 0x686   : > { %v2420_v59 = vmax.f32 %v2404_v25, 0.0 }
 0x687   : > { %v2369_v36 = vadd.f32 %v2353_v45, %v2339_v37 }
 0x688   : > { %2436 = vst [vmem:[%s3293_s24 + $0x50] sm:$0xff] %v2420_v59 }
 0x689   : > { %v2385_v34 = vadd.f32 %v2369_v36, %v1940_v47  ;;  %v2106_v60 = vpop.f32.mrf.mxu2  ;;  %v2155_v32 = vpop.f32.mrf.mxu3 }
 0x68a   : > { %v2248_v61 = vrot.slane %v2106_v60, 7  ;;  %v1761_v16 = vpop.f32.mrf.mxu1  ;;  %v2206_v53 = vpop.f32.mrf.mxu0 }
 0x68b   : > { %v2405_v41 = vadd.f32 %v3955_v17, %v2385_v34  ;;  %v1868_v15 = vrot.slane %v1761_v16, 1  ;;  %v2313_v9 = vrot.slane %v2206_v53, 1 }
 0x68c   : > { %v2276_v52 = vsel %vm816_vm4, 0.0, %v2248_v61 }
 0x68d   : > { %v2421_v40 = vmax.f32 %v2405_v41, 0.0  ;;  %v2354_v6 = vadd.f32 %v2276_v52, %v2155_v32  ;;  %v1869_v31 = vsel %vm1420_vm9, %v1867_v39, %v1868_v15  ;;  %v1895_v26 = vsel %vm1420_vm9, %v1868_v15, 0.0 }
 0x68e   : > { %v1925_v35 = vadd.f32 %v3912_v56, %v1869_v31  ;;  %v1926_v11 = vadd.f32 %v3924_v23, %v1895_v26  ;;  %v2314_v38 = vsel %vm1420_vm9, %v2312_v30, %v2313_v9  ;;  %v2340_v50 = vsel %vm1420_vm9, %v2313_v9, 0.0 }
 0x68f   : > { %2437 = vst [vmem:[%s3293_s24 + $0x58] sm:$0xff] %v2421_v40  ;;  %v2370_v3 = vadd.f32 %v2354_v6, %v2314_v38 }
 0x690   : > { %v1941_v48 = vadd.f32 %v1925_v35, %v3920_v13  ;;  %v1942_v33 = vadd.f32 %v1926_v11, %v3922_v57 }
 0x691   : > { %v2108_v42 = vpop.f32.mrf.mxu2  ;;  %v2157_v4 = vpop.f32.mrf.mxu3 }
 0x692   : > { %v2386_v55 = vadd.f32 %v2370_v3, %v1941_v48  ;;  %v2249_v21 = vrot.slane %v2108_v42, 7  ;;  %v1764_v1 = vpop.f32.mrf.mxu1  ;;  %v2209_v2 = vpop.f32.mrf.mxu0 }
 0x693   : > { %v2315_v5 = vrot.slane %v2209_v2, 1  ;;  %v1870_v22 = vrot.slane %v1764_v1, 1 }
 0x694   : > { %v2406_v43 = vadd.f32 %v3955_v17, %v2386_v55  ;;  %v2250_v56 = vsel %vm816_vm4, %v2248_v61, %v2249_v21 }
 0x695   : > { %v2355_v23 = vadd.f32 %v2250_v56, %v2157_v4 }
 0x696   : > { %v2422_v46 = vmax.f32 %v2406_v43, 0.0 }
 0x697   : > { %v2371_v8 = vadd.f32 %v2355_v23, %v2340_v50 }
 0x698   : > { %2438 = vst [vmem:[%s3293_s24 + $0x60] sm:$0xff] %v2422_v46 }
 0x699   : > { %v2387_v13 = vadd.f32 %v2371_v8, %v1942_v33  ;;  %v2111_v63 = vpop.f32.mrf.mxu2  ;;  %v2160_v57 = vpop.f32.mrf.mxu3 }
 0x69a   : > { %v2251_v28 = vrot.slane %v2111_v63, 7  ;;  %v1766_v18 = vpop.f32.mrf.mxu1  ;;  %v2211_v12 = vpop.f32.mrf.mxu0 }
 0x69b   : > { %v2407_v44 = vadd.f32 %v3955_v17, %v2387_v13  ;;  %v1871_v51 = vrot.slane %v1766_v18, 1  ;;  %v2316_v24 = vrot.slane %v2211_v12, 1 }
 0x69c   : > { %v2277_v47 = vsel %vm816_vm4, 0.0, %v2251_v28 }
 0x69d   : > { %v2423_v0 = vmax.f32 %v2407_v44, 0.0  ;;  %v2356_v29 = vadd.f32 %v2277_v47, %v2160_v57  ;;  %v1872_v20 = vsel %vm1420_vm9, %v1870_v22, %v1871_v51  ;;  %v1896_v7 = vsel %vm1420_vm9, %v1871_v51, 0.0 }
 0x69e   : > { %v1927_v27 = vadd.f32 %v3933_v54, %v1872_v20  ;;  %v1928_v62 = vadd.f32 %v3942_v49, %v1896_v7  ;;  %v2317_v58 = vsel %vm1420_vm9, %v2315_v5, %v2316_v24  ;;  %v2341_v49 = vsel %vm1420_vm9, %v2316_v24, 0.0 }
 0x69f   : > { %2439 = vst [vmem:[%s3293_s24 + $0x68] sm:$0xff] %v2423_v0  ;;  %v2372_v45 = vadd.f32 %v2356_v29, %v2317_v58 }
 0x6a0   : > { %v1943_v25 = vadd.f32 %v1927_v27, %v3938_v19  ;;  %v1944_v14 = vadd.f32 %v1928_v62, %v3940_v10 }
 0x6a1   : > { %v2113_v37 = vpop.f32.mrf.mxu2  ;;  %v2162_v60 = vpop.f32.mrf.mxu3 }
 0x6a2   : > { %v2388_v59 = vadd.f32 %v2372_v45, %v1943_v25  ;;  %v2252_v36 = vrot.slane %v2113_v37, 7 }
 0x6a4   : > { %v2408_v34 = vadd.f32 %v3955_v17, %v2388_v59  ;;  %v2253_v54 = vsel %vm816_vm4, %v2251_v28, %v2252_v36 }
 0x6a5   : > { %v2357_v32 = vadd.f32 %v2253_v54, %v2162_v60 }
 0x6a6   : > { %v2424_v30 = vmax.f32 %v2408_v34, 0.0 }
 0x6a7   : > { %v2373_v61 = vadd.f32 %v2357_v32, %v2341_v49 }
 0x6a8   : > { %2440 = vst [vmem:[%s3293_s24 + $0x70] sm:$0xff] %v2424_v30 }
 0x6a9   : > { %v2389_v16 = vadd.f32 %v2373_v61, %v1944_v14 }
 0x6ab   : > { %v2409_v19 = vadd.f32 %v3955_v17, %v2389_v16 }
 0x6ad   : > { %v2425_v10 = vmax.f32 %v2409_v19, 0.0 }
 0x6af   : > { %2441 = vst [vmem:[%s3293_s24 + $0x78] sm:$0xff] %v2425_v10 }
 0x6b0 PF: > { %s18_s9 = sadd.s32 1, %s3197_s9   ;;  %s4085_s27 = smov %s3189_s29 }
 0x6b1   : > { %p15_p10 = scmp.ge.s32.totalorder %s18_s9, 6   ;;  %s4086_s28 = smov %s3193_s30 }
 0x6b2   : > { %s4087_s29 = smov %s4090_s10  ;;  %s4088_s30 = smov %s4094_s11 }
 0x6b3   :  { %17 = sbr.rel (!%p15_p10) target bundleno = 3 (0x3), region = 105 }

</bundles_post_ra>
